<compile_context>
chip_gen: v7x
topology: tpu7x:2x2x1
jax: 0.10.0
libtpu: 0.0.40
codegen_flags: <defaults>
</compile_context>

<pallas_src>
import functools
import math

import jax
import jax.numpy as jnp
from jax import lax
from jax.experimental import pallas as pl
from jax.experimental.pallas import tpu as pltpu

# ----------------------------- configuration --------------------------------
HID_DIM = 32
N_HEADS = 4
HEAD_DIM = HID_DIM // N_HEADS
PF_DIM = 64
EPS = 1e-12           # LayerNorm variance_epsilon from the PyTorch module
B = 2                 # batch
S_T = 8               # target sequence length
S_S = 12              # source sequence length
# dropout = 0.0 / eval-mode => dropout layers are identity


# ------------------------------- kernel -------------------------------------
def decoder_layer_kernel(trg_ref, src_ref, attn_w_ref, ffn_w_ref, vec_ref,
                         out_ref,
                         *, batch, s_t, s_s, n_heads, head_dim, hid_dim, pf_dim):
    H = hid_dim
    inv_scale = jnp.float32(1.0 / math.sqrt(float(head_dim)))

    # Single (8,128) slab with all biases + LayerNorm params; loaded once.
    vec = vec_ref[...]

    # Lane masks selecting each head's 8-lane slice of the 32-lane hidden dim.
    # Hoisted to kernel top so the broadcasts are built once, not per attention.
    lane = lax.broadcasted_iota(jnp.int32, (1, H), 1)
    head_masks = [
        ((lane >= h * head_dim) & (lane < (h + 1) * head_dim)).astype(jnp.float32)
        for h in range(n_heads)
    ]

    def matmul(a, b):
        return jnp.dot(a, b, preferred_element_type=jnp.float32)

    def matmul_nt(a, b):
        # a @ b.T without materializing a transpose in the kernel.
        return lax.dot_general(a, b, (((1,), (1,)), ((), ())),
                               preferred_element_type=jnp.float32)

    def layer_norm(v, idx):
        gamma = vec[3:4, idx * H:(idx + 1) * H]          # (1, H)
        beta = vec[4:5, idx * H:(idx + 1) * H]           # (1, H)
        mean = jnp.mean(v, axis=-1, keepdims=True)
        c = v - mean
        # torch.std(..., unbiased=True): divide by (N - 1)
        var = jnp.sum(c * c, axis=-1, keepdims=True) * jnp.float32(1.0 / (H - 1))
        inv = pl.reciprocal(jnp.sqrt(var) + jnp.float32(EPS))   # exact
        return gamma * (c * inv) + beta

    def attention(idx, q_x, kv_x, q_seq, kv_seq, self_attn):
        # attn_w_ref[idx]: (H, 4H) = [Wq^T | Wk^T | Wv^T | Wfc^T]
        # vec[idx]:        (1, 4H) = [bq | bk | bv | bfc]
        w = attn_w_ref[idx]
        bias = vec[idx:idx + 1, :]

        # Fused projections: one MXU push per distinct input.
        q_proj = matmul(q_x, w)                               # (Nq, 4H)
        kv_proj = q_proj if self_attn else matmul(kv_x, w)    # (Nk, 4H)

        # Fold 1/sqrt(d) into Q once (instead of scaling scores per head).
        Q = (q_proj[:, 0:H] + bias[:, 0:H]) * inv_scale       # (Nq, H)
        K = kv_proj[:, H:2 * H] + bias[:, H:2 * H]            # (Nk, H)
        V = kv_proj[:, 2 * H:3 * H] + bias[:, 2 * H:3 * H]    # (Nk, H)

        # Per-batch, per-head scores/softmax/PV (heads must not mix in scores).
        ctx_rows = []
        for b in range(batch):
            qb = Q[b * q_seq:(b + 1) * q_seq]                 # (S_q, H)
            kb = K[b * kv_seq:(b + 1) * kv_seq]               # (S_k, H)
            vb = V[b * kv_seq:(b + 1) * kv_seq]               # (S_k, H)
            ctx_b = None
            for h in range(n_heads):
                lo = h * head_dim
                hi = lo + head_dim
                e = matmul_nt(qb[:, lo:hi], kb[:, lo:hi])     # (S_q, S_k)
                # numerically-stable softmax over the key axis (exact recip;
                # approx=True not adopted to protect the 1e-4 tolerance)
                e = e - jnp.max(e, axis=-1, keepdims=True)
                p = jnp.exp(e)
                attn = p * pl.reciprocal(jnp.sum(p, axis=-1, keepdims=True))
                # Full-width PV against lane-masked V writes this head's output
                # directly into its lane slice of the (S_q, H) context (exact:
                # other lanes receive +0).  Same MXU push cost as a (S_k,8) RHS.
                h_ctx = matmul(attn, vb * head_masks[h])      # (S_q, H)
                ctx_b = h_ctx if ctx_b is None else ctx_b + h_ctx
            ctx_rows.append(ctx_b)
        ctx = jnp.concatenate(ctx_rows, axis=0)               # (Nq, H), 8-row aligned

        # Single full-contraction (K = H = 32) output projection.
        return matmul(ctx, w[:, 3 * H:4 * H]) + bias[:, 3 * H:4 * H]

    # TODO(synk): trg_mask / cross_attn_mask path (masked_fill) not implemented —
    # the forward is evaluated with the default mask=None, matching the reference.

    x = trg_ref[...]                                          # (B*S_T, H) f32
    s = src_ref[...]                                          # (B*S_S, H) f32

    # --- block 1: self-attention + residual + LN ---
    x = layer_norm(x + attention(0, x, x, s_t, s_t, True), 0)
    # --- block 2: cross-attention + residual + LN ---
    x = layer_norm(x + attention(1, x, s, s_t, s_s, False), 1)
    # --- block 3: positionwise FFN (Conv1d k=1 == Linear) + residual + LN ---
    ffn_w = ffn_w_ref[...]                                    # (H+PF, PF)
    fc1_b = vec[2:3, 0:pf_dim]                                # (1, PF)
    fc2_b = vec[2:3, pf_dim:pf_dim + H]                       # (1, H)
    h1 = jnp.maximum(matmul(x, ffn_w[0:H, :]) + fc1_b, 0.0)   # (N, PF)
    h2 = matmul(h1, ffn_w[H:H + pf_dim, 0:H]) + fc2_b         # (N, H)
    x = layer_norm(x + h2, 2)

    out_ref[...] = x.astype(out_ref.dtype)


# --------------------- one-time host-side parameter packing -----------------
def pack_params(params):
    """Transpose + pack the 12 parameter arrays into 3 lane-dense slabs.

    Runs once at parameter-prep time (hoisted out of the per-call wrapper).
    """
    def pack_attn(w):                       # w: (4, H, H) PyTorch (out, in)
        wt = jnp.transpose(w, (0, 2, 1))    # -> (4, in, out)
        return jnp.concatenate([wt[0], wt[1], wt[2], wt[3]], axis=1)  # (H, 4H)

    attn_w = jnp.stack([pack_attn(params["sa_w"]),
                        pack_attn(params["ea_w"])], axis=0)   # (2, H, 4H)

    fc1_t = params["fc1_w"].T                                 # (H, PF)
    fc2_t = jnp.pad(params["fc2_w"].T,                        # (PF, H) -> (PF, PF)
                    ((0, 0), (0, PF_DIM - HID_DIM)))
    ffn_w = jnp.concatenate([fc1_t, fc2_t], axis=0)           # (H+PF, PF)

    vec = jnp.zeros((8, 128), jnp.float32)
    vec = vec.at[0, :].set(params["sa_b"].reshape(-1))                    # bq|bk|bv|bfc
    vec = vec.at[1, :].set(params["ea_b"].reshape(-1))
    vec = vec.at[2, 0:PF_DIM].set(params["fc1_b"].reshape(-1))
    vec = vec.at[2, PF_DIM:PF_DIM + HID_DIM].set(params["fc2_b"].reshape(-1))
    vec = vec.at[3, 0:3 * HID_DIM].set(params["ln_g"].reshape(-1))
    vec = vec.at[4, 0:3 * HID_DIM].set(params["ln_b"].reshape(-1))

    return {"attn_w": attn_w.astype(jnp.float32),
            "ffn_w": ffn_w.astype(jnp.float32),
            "vec": vec}


# ------------------------------- wrapper -------------------------------------
@jax.jit
def decoder_layer(trg, src, packed):
    B_, S_t, H = trg.shape
    _, S_s, _ = src.shape

    kernel = functools.partial(
        decoder_layer_kernel, batch=B_, s_t=S_t, s_s=S_s,
        n_heads=N_HEADS, head_dim=HEAD_DIM, hid_dim=H, pf_dim=PF_DIM)

    def vmem_spec():
        # Whole array resident in VMEM; no grid, no blocking, no double-buffering
        # (total footprint ~70 KB, far below any generation's VMEM limit).
        return pl.BlockSpec(memory_space=pltpu.MemorySpace.VMEM)

    out_flat = pl.pallas_call(
        kernel,
        out_shape=jax.ShapeDtypeStruct((B_ * S_t, H), trg.dtype),
        in_specs=[vmem_spec() for _ in range(5)],
        out_specs=vmem_spec(),
    )(trg.reshape(B_ * S_t, H), src.reshape(B_ * S_s, H),
      packed["attn_w"], packed["ffn_w"], packed["vec"])

    return out_flat.reshape(B_, S_t, H)


# --------------------------- pure-JAX reference ------------------------------
def reference(trg, src, p):
    def linear(x, w, b):
        return x @ w.T + b

    def ln(x, g, b):
        mean = x.mean(-1, keepdims=True)
        std = jnp.sqrt(((x - mean) ** 2).sum(-1, keepdims=True) / (x.shape[-1] - 1))
        return g * ((x - mean) / (std + EPS)) + b

    def attn(q_in, kv_in, w, b):
        Bq = q_in.shape[0]
        Q = linear(q_in, w[0], b[0])
        K = linear(kv_in, w[1], b[1])
        V = linear(kv_in, w[2], b[2])
        split = lambda t: t.reshape(Bq, -1, N_HEADS, HEAD_DIM).transpose(0, 2, 1, 3)
        Qh, Kh, Vh = split(Q), split(K), split(V)
        e = jnp.einsum("bhqd,bhkd->bhqk", Qh, Kh) / jnp.sqrt(jnp.float32(HEAD_DIM))
        a = jax.nn.softmax(e, axis=-1)
        o = jnp.einsum("bhqk,bhkd->bhqd", a, Vh)
        o = o.transpose(0, 2, 1, 3).reshape(Bq, -1, N_HEADS * HEAD_DIM)
        return linear(o, w[3], b[3])

    x = ln(trg + attn(trg, trg, p["sa_w"], p["sa_b"]), p["ln_g"][0], p["ln_b"][0])
    x = ln(x + attn(x, src, p["ea_w"], p["ea_b"]), p["ln_g"][1], p["ln_b"][1])
    h = jnp.maximum(linear(x, p["fc1_w"], p["fc1_b"][0]), 0.0)
    h = linear(h, p["fc2_w"], p["fc2_b"][0])
    x = ln(x + h, p["ln_g"][2], p["ln_b"][2])
    return x


# ------------------------------- main -----------------------------------------
if __name__ == "__main__":
    key = jax.random.PRNGKey(0)
    keys = jax.random.split(key, 12)

    def nrm(k, shape, scale=0.1):
        return (scale * jax.random.normal(k, shape)).astype(jnp.float32)

    params = {
        # stacked [W_q, W_k, W_v, W_fc] (PyTorch (out, in) layout) and biases
        # for the two attention blocks
        "sa_w": nrm(keys[0], (4, HID_DIM, HID_DIM)),
        "sa_b": nrm(keys[1], (4, HID_DIM)),
        "ea_w": nrm(keys[2], (4, HID_DIM, HID_DIM)),
        "ea_b": nrm(keys[3], (4, HID_DIM)),
        # Conv1d(k=1) weights squeezed to (out, in)
        "fc1_w": nrm(keys[4], (PF_DIM, HID_DIM)),
        "fc1_b": nrm(keys[5], (1, PF_DIM)),
        "fc2_w": nrm(keys[6], (HID_DIM, PF_DIM)),
        "fc2_b": nrm(keys[7], (1, HID_DIM)),
        # LayerNorm params: rows 0/1/2 = ln1/ln2/ln3 (gamma init 1, beta init 0,
        # perturbed deterministically so the affine part is actually exercised)
        "ln_g": (jnp.ones((3, HID_DIM), jnp.float32)
                 + 0.05 * jax.random.normal(keys[8], (3, HID_DIM))).astype(jnp.float32),
        "ln_b": nrm(keys[9], (3, HID_DIM), scale=0.05),
    }

    trg = nrm(keys[10], (B, S_T, HID_DIM), scale=1.0)
    src = nrm(keys[11], (B, S_S, HID_DIM), scale=1.0)

    # One-time parameter packing (transposes / slab packing hoisted out of the call).
    packed = pack_params(params)
    packed = jax.tree_util.tree_map(jax.block_until_ready, packed)

    out = decoder_layer(trg, src, packed)
    out = jax.block_until_ready(out)

    ref = jax.block_until_ready(reference(trg, src, params))
    assert out.shape == (B, S_T, HID_DIM)
    assert jnp.allclose(out, ref, atol=1e-4, rtol=1e-4), (
        f"max abs err = {jnp.max(jnp.abs(out - ref))}")

    print("KERNEL_OK")
</pallas_src>

<mosaic_0001>
module attributes {stable_mosaic.version = 11 : i64} {
  func.func @decoder_layer_kernel(%arg0: memref<16x32xf32, #tpu.memory_space<vmem>>, %arg1: memref<24x32xf32, #tpu.memory_space<vmem>>, %arg2: memref<2x32x128xf32, #tpu.memory_space<vmem>>, %arg3: memref<96x64xf32, #tpu.memory_space<vmem>>, %arg4: memref<8x128xf32, #tpu.memory_space<vmem>>, %arg5: memref<16x32xf32, #tpu.memory_space<vmem>>) attributes {dimension_semantics = [], scalar_prefetch = 0 : i64, scratch_operands = 0 : i64, tpu.core_type = #tpu.core_type<tc>} {
    %c0 = arith.constant 0 : index
    %c0_0 = arith.constant 0 : index
    %0 = vector.load %arg4[%c0, %c0_0] : memref<8x128xf32, #tpu.memory_space<vmem>>, vector<8x128xf32>
    %1 = tpu.iota {dimensions = array<i32: 1>} : vector<1x32xi32>
    %c0_i32 = arith.constant 0 : i32
    %2 = vector.broadcast %c0_i32 : i32 to vector<1x32xi32>
    %3 = arith.cmpi sge, %1, %2 : vector<1x32xi32>
    %c8_i32 = arith.constant 8 : i32
    %4 = vector.broadcast %c8_i32 : i32 to vector<1x32xi32>
    %5 = arith.cmpi slt, %1, %4 : vector<1x32xi32>
    %6 = arith.andi %3, %5 : vector<1x32xi1>
    %7 = arith.extui %6 : vector<1x32xi1> to vector<1x32xi32>
    %8 = arith.sitofp %7 : vector<1x32xi32> to vector<1x32xf32>
    %c8_i32_1 = arith.constant 8 : i32
    %9 = vector.broadcast %c8_i32_1 : i32 to vector<1x32xi32>
    %10 = arith.cmpi sge, %1, %9 : vector<1x32xi32>
    %c16_i32 = arith.constant 16 : i32
    %11 = vector.broadcast %c16_i32 : i32 to vector<1x32xi32>
    %12 = arith.cmpi slt, %1, %11 : vector<1x32xi32>
    %13 = arith.andi %10, %12 : vector<1x32xi1>
    %14 = arith.extui %13 : vector<1x32xi1> to vector<1x32xi32>
    %15 = arith.sitofp %14 : vector<1x32xi32> to vector<1x32xf32>
    %c16_i32_2 = arith.constant 16 : i32
    %16 = vector.broadcast %c16_i32_2 : i32 to vector<1x32xi32>
    %17 = arith.cmpi sge, %1, %16 : vector<1x32xi32>
    %c24_i32 = arith.constant 24 : i32
    %18 = vector.broadcast %c24_i32 : i32 to vector<1x32xi32>
    %19 = arith.cmpi slt, %1, %18 : vector<1x32xi32>
    %20 = arith.andi %17, %19 : vector<1x32xi1>
    %21 = arith.extui %20 : vector<1x32xi1> to vector<1x32xi32>
    %22 = arith.sitofp %21 : vector<1x32xi32> to vector<1x32xf32>
    %c24_i32_3 = arith.constant 24 : i32
    %23 = vector.broadcast %c24_i32_3 : i32 to vector<1x32xi32>
    %24 = arith.cmpi sge, %1, %23 : vector<1x32xi32>
    %c32_i32 = arith.constant 32 : i32
    %25 = vector.broadcast %c32_i32 : i32 to vector<1x32xi32>
    %26 = arith.cmpi slt, %1, %25 : vector<1x32xi32>
    %27 = arith.andi %24, %26 : vector<1x32xi1>
    %28 = arith.extui %27 : vector<1x32xi1> to vector<1x32xi32>
    %29 = arith.sitofp %28 : vector<1x32xi32> to vector<1x32xf32>
    %c0_4 = arith.constant 0 : index
    %c0_5 = arith.constant 0 : index
    %30 = vector.load %arg0[%c0_4, %c0_5] : memref<16x32xf32, #tpu.memory_space<vmem>>, vector<16x32xf32>
    %c0_6 = arith.constant 0 : index
    %c0_7 = arith.constant 0 : index
    %31 = vector.load %arg1[%c0_6, %c0_7] : memref<24x32xf32, #tpu.memory_space<vmem>>, vector<24x32xf32>
    %c0_8 = arith.constant 0 : index
    %c0_9 = arith.constant 0 : index
    %c0_10 = arith.constant 0 : index
    %32 = vector.load %arg2[%c0_8, %c0_9, %c0_10] : memref<2x32x128xf32, #tpu.memory_space<vmem>>, vector<1x32x128xf32>
    %33 = vector.shape_cast %32 : vector<1x32x128xf32> to vector<32x128xf32>
    %34 = vector.extract_strided_slice %0 {offsets = [0, 0], sizes = [1, 128], strides = [1, 1]} : vector<8x128xf32> to vector<1x128xf32>
    %cst = arith.constant dense<0.000000e+00> : vector<16x128xf32>
    %35 = tpu.matmul %30, %33, %cst {dimension_numbers = #tpu.dot_dimension_numbers<[1], [0], [0], [1], [0, 0, 1, 1], [], []>} : vector<16x32xf32>, vector<32x128xf32>, vector<16x128xf32> -> vector<16x128xf32>
    %36 = vector.extract_strided_slice %35 {offsets = [0, 0], sizes = [16, 32], strides = [1, 1]} : vector<16x128xf32> to vector<16x32xf32>
    %37 = vector.extract_strided_slice %34 {offsets = [0, 0], sizes = [1, 32], strides = [1, 1]} : vector<1x128xf32> to vector<1x32xf32>
    %38 = vector.broadcast %37 : vector<1x32xf32> to vector<16x32xf32>
    %39 = arith.addf %36, %38 : vector<16x32xf32>
    %cst_11 = arith.constant 0.353553385 : f32
    %40 = vector.broadcast %cst_11 : f32 to vector<16x32xf32>
    %41 = arith.mulf %39, %40 : vector<16x32xf32>
    %42 = vector.extract_strided_slice %35 {offsets = [0, 32], sizes = [16, 32], strides = [1, 1]} : vector<16x128xf32> to vector<16x32xf32>
    %43 = vector.extract_strided_slice %34 {offsets = [0, 32], sizes = [1, 32], strides = [1, 1]} : vector<1x128xf32> to vector<1x32xf32>
    %44 = vector.broadcast %43 : vector<1x32xf32> to vector<16x32xf32>
    %45 = arith.addf %42, %44 : vector<16x32xf32>
    %46 = vector.extract_strided_slice %35 {offsets = [0, 64], sizes = [16, 32], strides = [1, 1]} : vector<16x128xf32> to vector<16x32xf32>
    %47 = vector.extract_strided_slice %34 {offsets = [0, 64], sizes = [1, 32], strides = [1, 1]} : vector<1x128xf32> to vector<1x32xf32>
    %48 = vector.broadcast %47 : vector<1x32xf32> to vector<16x32xf32>
    %49 = arith.addf %46, %48 : vector<16x32xf32>
    %50 = vector.extract_strided_slice %41 {offsets = [0, 0], sizes = [8, 32], strides = [1, 1]} : vector<16x32xf32> to vector<8x32xf32>
    %51 = vector.extract_strided_slice %45 {offsets = [0, 0], sizes = [8, 32], strides = [1, 1]} : vector<16x32xf32> to vector<8x32xf32>
    %52 = vector.extract_strided_slice %49 {offsets = [0, 0], sizes = [8, 32], strides = [1, 1]} : vector<16x32xf32> to vector<8x32xf32>
    %53 = vector.extract_strided_slice %50 {offsets = [0, 0], sizes = [8, 8], strides = [1, 1]} : vector<8x32xf32> to vector<8x8xf32>
    %54 = vector.extract_strided_slice %51 {offsets = [0, 0], sizes = [8, 8], strides = [1, 1]} : vector<8x32xf32> to vector<8x8xf32>
    %cst_12 = arith.constant dense<0.000000e+00> : vector<8x8xf32>
    %55 = tpu.matmul %53, %54, %cst_12 {dimension_numbers = #tpu.dot_dimension_numbers<[1], [1], [0], [0], [0, 0, 1, 0], [], []>} : vector<8x8xf32>, vector<8x8xf32>, vector<8x8xf32> -> vector<8x8xf32>
    %cst_13 = arith.constant dense<0xFF800000> : vector<8xf32>
    %56 = vector.multi_reduction <maximumf>, %55, %cst_13 [1] : vector<8x8xf32> to vector<8xf32>
    %57 = vector.shape_cast %56 : vector<8xf32> to vector<8x1xf32>
    %58 = vector.broadcast %57 : vector<8x1xf32> to vector<8x8xf32>
    %59 = arith.subf %55, %58 : vector<8x8xf32>
    %60 = math.exp %59 : vector<8x8xf32>
    %cst_14 = arith.constant dense<0.000000e+00> : vector<8xf32>
    %61 = vector.multi_reduction <add>, %60, %cst_14 [1] : vector<8x8xf32> to vector<8xf32>
    %62 = vector.shape_cast %61 : vector<8xf32> to vector<8x1xf32>
    %63 = tpu.reciprocal %62 : vector<8x1xf32> -> vector<8x1xf32>
    %64 = vector.broadcast %63 : vector<8x1xf32> to vector<8x8xf32>
    %65 = arith.mulf %60, %64 : vector<8x8xf32>
    %66 = vector.broadcast %8 : vector<1x32xf32> to vector<8x32xf32>
    %67 = arith.mulf %52, %66 : vector<8x32xf32>
    %cst_15 = arith.constant dense<0.000000e+00> : vector<8x32xf32>
    %68 = tpu.matmul %65, %67, %cst_15 {dimension_numbers = #tpu.dot_dimension_numbers<[1], [0], [0], [1], [0, 0, 1, 1], [], []>} : vector<8x8xf32>, vector<8x32xf32>, vector<8x32xf32> -> vector<8x32xf32>
    %69 = vector.extract_strided_slice %50 {offsets = [0, 8], sizes = [8, 8], strides = [1, 1]} : vector<8x32xf32> to vector<8x8xf32>
    %70 = vector.extract_strided_slice %51 {offsets = [0, 8], sizes = [8, 8], strides = [1, 1]} : vector<8x32xf32> to vector<8x8xf32>
    %cst_16 = arith.constant dense<0.000000e+00> : vector<8x8xf32>
    %71 = tpu.matmul %69, %70, %cst_16 {dimension_numbers = #tpu.dot_dimension_numbers<[1], [1], [0], [0], [0, 0, 1, 0], [], []>} : vector<8x8xf32>, vector<8x8xf32>, vector<8x8xf32> -> vector<8x8xf32>
    %cst_17 = arith.constant dense<0xFF800000> : vector<8xf32>
    %72 = vector.multi_reduction <maximumf>, %71, %cst_17 [1] : vector<8x8xf32> to vector<8xf32>
    %73 = vector.shape_cast %72 : vector<8xf32> to vector<8x1xf32>
    %74 = vector.broadcast %73 : vector<8x1xf32> to vector<8x8xf32>
    %75 = arith.subf %71, %74 : vector<8x8xf32>
    %76 = math.exp %75 : vector<8x8xf32>
    %cst_18 = arith.constant dense<0.000000e+00> : vector<8xf32>
    %77 = vector.multi_reduction <add>, %76, %cst_18 [1] : vector<8x8xf32> to vector<8xf32>
    %78 = vector.shape_cast %77 : vector<8xf32> to vector<8x1xf32>
    %79 = tpu.reciprocal %78 : vector<8x1xf32> -> vector<8x1xf32>
    %80 = vector.broadcast %79 : vector<8x1xf32> to vector<8x8xf32>
    %81 = arith.mulf %76, %80 : vector<8x8xf32>
    %82 = vector.broadcast %15 : vector<1x32xf32> to vector<8x32xf32>
    %83 = arith.mulf %52, %82 : vector<8x32xf32>
    %cst_19 = arith.constant dense<0.000000e+00> : vector<8x32xf32>
    %84 = tpu.matmul %81, %83, %cst_19 {dimension_numbers = #tpu.dot_dimension_numbers<[1], [0], [0], [1], [0, 0, 1, 1], [], []>} : vector<8x8xf32>, vector<8x32xf32>, vector<8x32xf32> -> vector<8x32xf32>
    %85 = arith.addf %68, %84 : vector<8x32xf32>
    %86 = vector.extract_strided_slice %50 {offsets = [0, 16], sizes = [8, 8], strides = [1, 1]} : vector<8x32xf32> to vector<8x8xf32>
    %87 = vector.extract_strided_slice %51 {offsets = [0, 16], sizes = [8, 8], strides = [1, 1]} : vector<8x32xf32> to vector<8x8xf32>
    %cst_20 = arith.constant dense<0.000000e+00> : vector<8x8xf32>
    %88 = tpu.matmul %86, %87, %cst_20 {dimension_numbers = #tpu.dot_dimension_numbers<[1], [1], [0], [0], [0, 0, 1, 0], [], []>} : vector<8x8xf32>, vector<8x8xf32>, vector<8x8xf32> -> vector<8x8xf32>
    %cst_21 = arith.constant dense<0xFF800000> : vector<8xf32>
    %89 = vector.multi_reduction <maximumf>, %88, %cst_21 [1] : vector<8x8xf32> to vector<8xf32>
    %90 = vector.shape_cast %89 : vector<8xf32> to vector<8x1xf32>
    %91 = vector.broadcast %90 : vector<8x1xf32> to vector<8x8xf32>
    %92 = arith.subf %88, %91 : vector<8x8xf32>
    %93 = math.exp %92 : vector<8x8xf32>
    %cst_22 = arith.constant dense<0.000000e+00> : vector<8xf32>
    %94 = vector.multi_reduction <add>, %93, %cst_22 [1] : vector<8x8xf32> to vector<8xf32>
    %95 = vector.shape_cast %94 : vector<8xf32> to vector<8x1xf32>
    %96 = tpu.reciprocal %95 : vector<8x1xf32> -> vector<8x1xf32>
    %97 = vector.broadcast %96 : vector<8x1xf32> to vector<8x8xf32>
    %98 = arith.mulf %93, %97 : vector<8x8xf32>
    %99 = vector.broadcast %22 : vector<1x32xf32> to vector<8x32xf32>
    %100 = arith.mulf %52, %99 : vector<8x32xf32>
    %cst_23 = arith.constant dense<0.000000e+00> : vector<8x32xf32>
    %101 = tpu.matmul %98, %100, %cst_23 {dimension_numbers = #tpu.dot_dimension_numbers<[1], [0], [0], [1], [0, 0, 1, 1], [], []>} : vector<8x8xf32>, vector<8x32xf32>, vector<8x32xf32> -> vector<8x32xf32>
    %102 = arith.addf %85, %101 : vector<8x32xf32>
    %103 = vector.extract_strided_slice %50 {offsets = [0, 24], sizes = [8, 8], strides = [1, 1]} : vector<8x32xf32> to vector<8x8xf32>
    %104 = vector.extract_strided_slice %51 {offsets = [0, 24], sizes = [8, 8], strides = [1, 1]} : vector<8x32xf32> to vector<8x8xf32>
    %cst_24 = arith.constant dense<0.000000e+00> : vector<8x8xf32>
    %105 = tpu.matmul %103, %104, %cst_24 {dimension_numbers = #tpu.dot_dimension_numbers<[1], [1], [0], [0], [0, 0, 1, 0], [], []>} : vector<8x8xf32>, vector<8x8xf32>, vector<8x8xf32> -> vector<8x8xf32>
    %cst_25 = arith.constant dense<0xFF800000> : vector<8xf32>
    %106 = vector.multi_reduction <maximumf>, %105, %cst_25 [1] : vector<8x8xf32> to vector<8xf32>
    %107 = vector.shape_cast %106 : vector<8xf32> to vector<8x1xf32>
    %108 = vector.broadcast %107 : vector<8x1xf32> to vector<8x8xf32>
    %109 = arith.subf %105, %108 : vector<8x8xf32>
    %110 = math.exp %109 : vector<8x8xf32>
    %cst_26 = arith.constant dense<0.000000e+00> : vector<8xf32>
    %111 = vector.multi_reduction <add>, %110, %cst_26 [1] : vector<8x8xf32> to vector<8xf32>
    %112 = vector.shape_cast %111 : vector<8xf32> to vector<8x1xf32>
    %113 = tpu.reciprocal %112 : vector<8x1xf32> -> vector<8x1xf32>
    %114 = vector.broadcast %113 : vector<8x1xf32> to vector<8x8xf32>
    %115 = arith.mulf %110, %114 : vector<8x8xf32>
    %116 = vector.broadcast %29 : vector<1x32xf32> to vector<8x32xf32>
    %117 = arith.mulf %52, %116 : vector<8x32xf32>
    %cst_27 = arith.constant dense<0.000000e+00> : vector<8x32xf32>
    %118 = tpu.matmul %115, %117, %cst_27 {dimension_numbers = #tpu.dot_dimension_numbers<[1], [0], [0], [1], [0, 0, 1, 1], [], []>} : vector<8x8xf32>, vector<8x32xf32>, vector<8x32xf32> -> vector<8x32xf32>
    %119 = arith.addf %102, %118 : vector<8x32xf32>
    %120 = vector.extract_strided_slice %41 {offsets = [8, 0], sizes = [8, 32], strides = [1, 1]} : vector<16x32xf32> to vector<8x32xf32>
    %121 = vector.extract_strided_slice %45 {offsets = [8, 0], sizes = [8, 32], strides = [1, 1]} : vector<16x32xf32> to vector<8x32xf32>
    %122 = vector.extract_strided_slice %49 {offsets = [8, 0], sizes = [8, 32], strides = [1, 1]} : vector<16x32xf32> to vector<8x32xf32>
    %123 = vector.extract_strided_slice %120 {offsets = [0, 0], sizes = [8, 8], strides = [1, 1]} : vector<8x32xf32> to vector<8x8xf32>
    %124 = vector.extract_strided_slice %121 {offsets = [0, 0], sizes = [8, 8], strides = [1, 1]} : vector<8x32xf32> to vector<8x8xf32>
    %cst_28 = arith.constant dense<0.000000e+00> : vector<8x8xf32>
    %125 = tpu.matmul %123, %124, %cst_28 {dimension_numbers = #tpu.dot_dimension_numbers<[1], [1], [0], [0], [0, 0, 1, 0], [], []>} : vector<8x8xf32>, vector<8x8xf32>, vector<8x8xf32> -> vector<8x8xf32>
    %cst_29 = arith.constant dense<0xFF800000> : vector<8xf32>
    %126 = vector.multi_reduction <maximumf>, %125, %cst_29 [1] : vector<8x8xf32> to vector<8xf32>
    %127 = vector.shape_cast %126 : vector<8xf32> to vector<8x1xf32>
    %128 = vector.broadcast %127 : vector<8x1xf32> to vector<8x8xf32>
    %129 = arith.subf %125, %128 : vector<8x8xf32>
    %130 = math.exp %129 : vector<8x8xf32>
    %cst_30 = arith.constant dense<0.000000e+00> : vector<8xf32>
    %131 = vector.multi_reduction <add>, %130, %cst_30 [1] : vector<8x8xf32> to vector<8xf32>
    %132 = vector.shape_cast %131 : vector<8xf32> to vector<8x1xf32>
    %133 = tpu.reciprocal %132 : vector<8x1xf32> -> vector<8x1xf32>
    %134 = vector.broadcast %133 : vector<8x1xf32> to vector<8x8xf32>
    %135 = arith.mulf %130, %134 : vector<8x8xf32>
    %136 = vector.broadcast %8 : vector<1x32xf32> to vector<8x32xf32>
    %137 = arith.mulf %122, %136 : vector<8x32xf32>
    %cst_31 = arith.constant dense<0.000000e+00> : vector<8x32xf32>
    %138 = tpu.matmul %135, %137, %cst_31 {dimension_numbers = #tpu.dot_dimension_numbers<[1], [0], [0], [1], [0, 0, 1, 1], [], []>} : vector<8x8xf32>, vector<8x32xf32>, vector<8x32xf32> -> vector<8x32xf32>
    %139 = vector.extract_strided_slice %120 {offsets = [0, 8], sizes = [8, 8], strides = [1, 1]} : vector<8x32xf32> to vector<8x8xf32>
    %140 = vector.extract_strided_slice %121 {offsets = [0, 8], sizes = [8, 8], strides = [1, 1]} : vector<8x32xf32> to vector<8x8xf32>
    %cst_32 = arith.constant dense<0.000000e+00> : vector<8x8xf32>
    %141 = tpu.matmul %139, %140, %cst_32 {dimension_numbers = #tpu.dot_dimension_numbers<[1], [1], [0], [0], [0, 0, 1, 0], [], []>} : vector<8x8xf32>, vector<8x8xf32>, vector<8x8xf32> -> vector<8x8xf32>
    %cst_33 = arith.constant dense<0xFF800000> : vector<8xf32>
    %142 = vector.multi_reduction <maximumf>, %141, %cst_33 [1] : vector<8x8xf32> to vector<8xf32>
    %143 = vector.shape_cast %142 : vector<8xf32> to vector<8x1xf32>
    %144 = vector.broadcast %143 : vector<8x1xf32> to vector<8x8xf32>
    %145 = arith.subf %141, %144 : vector<8x8xf32>
    %146 = math.exp %145 : vector<8x8xf32>
    %cst_34 = arith.constant dense<0.000000e+00> : vector<8xf32>
    %147 = vector.multi_reduction <add>, %146, %cst_34 [1] : vector<8x8xf32> to vector<8xf32>
    %148 = vector.shape_cast %147 : vector<8xf32> to vector<8x1xf32>
    %149 = tpu.reciprocal %148 : vector<8x1xf32> -> vector<8x1xf32>
    %150 = vector.broadcast %149 : vector<8x1xf32> to vector<8x8xf32>
    %151 = arith.mulf %146, %150 : vector<8x8xf32>
    %152 = vector.broadcast %15 : vector<1x32xf32> to vector<8x32xf32>
    %153 = arith.mulf %122, %152 : vector<8x32xf32>
    %cst_35 = arith.constant dense<0.000000e+00> : vector<8x32xf32>
    %154 = tpu.matmul %151, %153, %cst_35 {dimension_numbers = #tpu.dot_dimension_numbers<[1], [0], [0], [1], [0, 0, 1, 1], [], []>} : vector<8x8xf32>, vector<8x32xf32>, vector<8x32xf32> -> vector<8x32xf32>
    %155 = arith.addf %138, %154 : vector<8x32xf32>
    %156 = vector.extract_strided_slice %120 {offsets = [0, 16], sizes = [8, 8], strides = [1, 1]} : vector<8x32xf32> to vector<8x8xf32>
    %157 = vector.extract_strided_slice %121 {offsets = [0, 16], sizes = [8, 8], strides = [1, 1]} : vector<8x32xf32> to vector<8x8xf32>
    %cst_36 = arith.constant dense<0.000000e+00> : vector<8x8xf32>
    %158 = tpu.matmul %156, %157, %cst_36 {dimension_numbers = #tpu.dot_dimension_numbers<[1], [1], [0], [0], [0, 0, 1, 0], [], []>} : vector<8x8xf32>, vector<8x8xf32>, vector<8x8xf32> -> vector<8x8xf32>
    %cst_37 = arith.constant dense<0xFF800000> : vector<8xf32>
    %159 = vector.multi_reduction <maximumf>, %158, %cst_37 [1] : vector<8x8xf32> to vector<8xf32>
    %160 = vector.shape_cast %159 : vector<8xf32> to vector<8x1xf32>
    %161 = vector.broadcast %160 : vector<8x1xf32> to vector<8x8xf32>
    %162 = arith.subf %158, %161 : vector<8x8xf32>
    %163 = math.exp %162 : vector<8x8xf32>
    %cst_38 = arith.constant dense<0.000000e+00> : vector<8xf32>
    %164 = vector.multi_reduction <add>, %163, %cst_38 [1] : vector<8x8xf32> to vector<8xf32>
    %165 = vector.shape_cast %164 : vector<8xf32> to vector<8x1xf32>
    %166 = tpu.reciprocal %165 : vector<8x1xf32> -> vector<8x1xf32>
    %167 = vector.broadcast %166 : vector<8x1xf32> to vector<8x8xf32>
    %168 = arith.mulf %163, %167 : vector<8x8xf32>
    %169 = vector.broadcast %22 : vector<1x32xf32> to vector<8x32xf32>
    %170 = arith.mulf %122, %169 : vector<8x32xf32>
    %cst_39 = arith.constant dense<0.000000e+00> : vector<8x32xf32>
    %171 = tpu.matmul %168, %170, %cst_39 {dimension_numbers = #tpu.dot_dimension_numbers<[1], [0], [0], [1], [0, 0, 1, 1], [], []>} : vector<8x8xf32>, vector<8x32xf32>, vector<8x32xf32> -> vector<8x32xf32>
    %172 = arith.addf %155, %171 : vector<8x32xf32>
    %173 = vector.extract_strided_slice %120 {offsets = [0, 24], sizes = [8, 8], strides = [1, 1]} : vector<8x32xf32> to vector<8x8xf32>
    %174 = vector.extract_strided_slice %121 {offsets = [0, 24], sizes = [8, 8], strides = [1, 1]} : vector<8x32xf32> to vector<8x8xf32>
    %cst_40 = arith.constant dense<0.000000e+00> : vector<8x8xf32>
    %175 = tpu.matmul %173, %174, %cst_40 {dimension_numbers = #tpu.dot_dimension_numbers<[1], [1], [0], [0], [0, 0, 1, 0], [], []>} : vector<8x8xf32>, vector<8x8xf32>, vector<8x8xf32> -> vector<8x8xf32>
    %cst_41 = arith.constant dense<0xFF800000> : vector<8xf32>
    %176 = vector.multi_reduction <maximumf>, %175, %cst_41 [1] : vector<8x8xf32> to vector<8xf32>
    %177 = vector.shape_cast %176 : vector<8xf32> to vector<8x1xf32>
    %178 = vector.broadcast %177 : vector<8x1xf32> to vector<8x8xf32>
    %179 = arith.subf %175, %178 : vector<8x8xf32>
    %180 = math.exp %179 : vector<8x8xf32>
    %cst_42 = arith.constant dense<0.000000e+00> : vector<8xf32>
    %181 = vector.multi_reduction <add>, %180, %cst_42 [1] : vector<8x8xf32> to vector<8xf32>
    %182 = vector.shape_cast %181 : vector<8xf32> to vector<8x1xf32>
    %183 = tpu.reciprocal %182 : vector<8x1xf32> -> vector<8x1xf32>
    %184 = vector.broadcast %183 : vector<8x1xf32> to vector<8x8xf32>
    %185 = arith.mulf %180, %184 : vector<8x8xf32>
    %186 = vector.broadcast %29 : vector<1x32xf32> to vector<8x32xf32>
    %187 = arith.mulf %122, %186 : vector<8x32xf32>
    %cst_43 = arith.constant dense<0.000000e+00> : vector<8x32xf32>
    %188 = tpu.matmul %185, %187, %cst_43 {dimension_numbers = #tpu.dot_dimension_numbers<[1], [0], [0], [1], [0, 0, 1, 1], [], []>} : vector<8x8xf32>, vector<8x32xf32>, vector<8x32xf32> -> vector<8x32xf32>
    %189 = arith.addf %172, %188 : vector<8x32xf32>
    %190 = tpu.concatenate %119, %189 in 0 : vector<8x32xf32>, vector<8x32xf32> -> vector<16x32xf32>
    %191 = vector.extract_strided_slice %33 {offsets = [0, 96], sizes = [32, 32], strides = [1, 1]} : vector<32x128xf32> to vector<32x32xf32>
    %cst_44 = arith.constant dense<0.000000e+00> : vector<16x32xf32>
    %192 = tpu.matmul %190, %191, %cst_44 {dimension_numbers = #tpu.dot_dimension_numbers<[1], [0], [0], [1], [0, 0, 1, 1], [], []>} : vector<16x32xf32>, vector<32x32xf32>, vector<16x32xf32> -> vector<16x32xf32>
    %193 = vector.extract_strided_slice %34 {offsets = [0, 96], sizes = [1, 32], strides = [1, 1]} : vector<1x128xf32> to vector<1x32xf32>
    %194 = vector.broadcast %193 : vector<1x32xf32> to vector<16x32xf32>
    %195 = arith.addf %192, %194 : vector<16x32xf32>
    %196 = arith.addf %30, %195 : vector<16x32xf32>
    %197 = vector.extract_strided_slice %0 {offsets = [3, 0], sizes = [1, 32], strides = [1, 1]} : vector<8x128xf32> to vector<1x32xf32>
    %198 = vector.extract_strided_slice %0 {offsets = [4, 0], sizes = [1, 32], strides = [1, 1]} : vector<8x128xf32> to vector<1x32xf32>
    %cst_45 = arith.constant dense<0.000000e+00> : vector<16xf32>
    %199 = vector.multi_reduction <add>, %196, %cst_45 [1] : vector<16x32xf32> to vector<16xf32>
    %200 = vector.shape_cast %199 : vector<16xf32> to vector<16x1xf32>
    %cst_46 = arith.constant 3.200000e+01 : f32
    %201 = vector.broadcast %cst_46 : f32 to vector<16x1xf32>
    %202 = arith.divf %200, %201 : vector<16x1xf32>
    %203 = vector.broadcast %202 : vector<16x1xf32> to vector<16x32xf32>
    %204 = arith.subf %196, %203 : vector<16x32xf32>
    %205 = arith.mulf %204, %204 : vector<16x32xf32>
    %cst_47 = arith.constant dense<0.000000e+00> : vector<16xf32>
    %206 = vector.multi_reduction <add>, %205, %cst_47 [1] : vector<16x32xf32> to vector<16xf32>
    %207 = vector.shape_cast %206 : vector<16xf32> to vector<16x1xf32>
    %cst_48 = arith.constant 0.0322580636 : f32
    %208 = vector.broadcast %cst_48 : f32 to vector<16x1xf32>
    %209 = arith.mulf %207, %208 : vector<16x1xf32>
    %210 = math.sqrt %209 : vector<16x1xf32>
    %cst_49 = arith.constant 9.99999996E-13 : f32
    %211 = vector.broadcast %cst_49 : f32 to vector<16x1xf32>
    %212 = arith.addf %210, %211 : vector<16x1xf32>
    %213 = tpu.reciprocal %212 : vector<16x1xf32> -> vector<16x1xf32>
    %214 = vector.broadcast %213 : vector<16x1xf32> to vector<16x32xf32>
    %215 = arith.mulf %204, %214 : vector<16x32xf32>
    %216 = vector.broadcast %197 : vector<1x32xf32> to vector<16x32xf32>
    %217 = arith.mulf %216, %215 : vector<16x32xf32>
    %218 = vector.broadcast %198 : vector<1x32xf32> to vector<16x32xf32>
    %219 = arith.addf %217, %218 : vector<16x32xf32>
    %c1 = arith.constant 1 : index
    %c0_50 = arith.constant 0 : index
    %c0_51 = arith.constant 0 : index
    %220 = vector.load %arg2[%c1, %c0_50, %c0_51] : memref<2x32x128xf32, #tpu.memory_space<vmem>>, vector<1x32x128xf32>
    %221 = vector.shape_cast %220 : vector<1x32x128xf32> to vector<32x128xf32>
    %222 = vector.extract_strided_slice %0 {offsets = [1, 0], sizes = [1, 128], strides = [1, 1]} : vector<8x128xf32> to vector<1x128xf32>
    %cst_52 = arith.constant dense<0.000000e+00> : vector<16x128xf32>
    %223 = tpu.matmul %219, %221, %cst_52 {dimension_numbers = #tpu.dot_dimension_numbers<[1], [0], [0], [1], [0, 0, 1, 1], [], []>} : vector<16x32xf32>, vector<32x128xf32>, vector<16x128xf32> -> vector<16x128xf32>
    %cst_53 = arith.constant dense<0.000000e+00> : vector<24x128xf32>
    %224 = tpu.matmul %31, %221, %cst_53 {dimension_numbers = #tpu.dot_dimension_numbers<[1], [0], [0], [1], [0, 0, 1, 1], [], []>} : vector<24x32xf32>, vector<32x128xf32>, vector<24x128xf32> -> vector<24x128xf32>
    %225 = vector.extract_strided_slice %223 {offsets = [0, 0], sizes = [16, 32], strides = [1, 1]} : vector<16x128xf32> to vector<16x32xf32>
    %226 = vector.extract_strided_slice %222 {offsets = [0, 0], sizes = [1, 32], strides = [1, 1]} : vector<1x128xf32> to vector<1x32xf32>
    %227 = vector.broadcast %226 : vector<1x32xf32> to vector<16x32xf32>
    %228 = arith.addf %225, %227 : vector<16x32xf32>
    %cst_54 = arith.constant 0.353553385 : f32
    %229 = vector.broadcast %cst_54 : f32 to vector<16x32xf32>
    %230 = arith.mulf %228, %229 : vector<16x32xf32>
    %231 = vector.extract_strided_slice %224 {offsets = [0, 32], sizes = [24, 32], strides = [1, 1]} : vector<24x128xf32> to vector<24x32xf32>
    %232 = vector.extract_strided_slice %222 {offsets = [0, 32], sizes = [1, 32], strides = [1, 1]} : vector<1x128xf32> to vector<1x32xf32>
    %233 = vector.broadcast %232 : vector<1x32xf32> to vector<24x32xf32>
    %234 = arith.addf %231, %233 : vector<24x32xf32>
    %235 = vector.extract_strided_slice %224 {offsets = [0, 64], sizes = [24, 32], strides = [1, 1]} : vector<24x128xf32> to vector<24x32xf32>
    %236 = vector.extract_strided_slice %222 {offsets = [0, 64], sizes = [1, 32], strides = [1, 1]} : vector<1x128xf32> to vector<1x32xf32>
    %237 = vector.broadcast %236 : vector<1x32xf32> to vector<24x32xf32>
    %238 = arith.addf %235, %237 : vector<24x32xf32>
    %239 = vector.extract_strided_slice %230 {offsets = [0, 0], sizes = [8, 32], strides = [1, 1]} : vector<16x32xf32> to vector<8x32xf32>
    %240 = vector.extract_strided_slice %234 {offsets = [0, 0], sizes = [12, 32], strides = [1, 1]} : vector<24x32xf32> to vector<12x32xf32>
    %241 = vector.extract_strided_slice %238 {offsets = [0, 0], sizes = [12, 32], strides = [1, 1]} : vector<24x32xf32> to vector<12x32xf32>
    %242 = vector.extract_strided_slice %239 {offsets = [0, 0], sizes = [8, 8], strides = [1, 1]} : vector<8x32xf32> to vector<8x8xf32>
    %243 = vector.extract_strided_slice %240 {offsets = [0, 0], sizes = [12, 8], strides = [1, 1]} : vector<12x32xf32> to vector<12x8xf32>
    %cst_55 = arith.constant dense<0.000000e+00> : vector<8x12xf32>
    %244 = tpu.matmul %242, %243, %cst_55 {dimension_numbers = #tpu.dot_dimension_numbers<[1], [1], [0], [0], [0, 0, 1, 0], [], []>} : vector<8x8xf32>, vector<12x8xf32>, vector<8x12xf32> -> vector<8x12xf32>
    %cst_56 = arith.constant dense<0xFF800000> : vector<8xf32>
    %245 = vector.multi_reduction <maximumf>, %244, %cst_56 [1] : vector<8x12xf32> to vector<8xf32>
    %246 = vector.shape_cast %245 : vector<8xf32> to vector<8x1xf32>
    %247 = vector.broadcast %246 : vector<8x1xf32> to vector<8x12xf32>
    %248 = arith.subf %244, %247 : vector<8x12xf32>
    %249 = math.exp %248 : vector<8x12xf32>
    %cst_57 = arith.constant dense<0.000000e+00> : vector<8xf32>
    %250 = vector.multi_reduction <add>, %249, %cst_57 [1] : vector<8x12xf32> to vector<8xf32>
    %251 = vector.shape_cast %250 : vector<8xf32> to vector<8x1xf32>
    %252 = tpu.reciprocal %251 : vector<8x1xf32> -> vector<8x1xf32>
    %253 = vector.broadcast %252 : vector<8x1xf32> to vector<8x12xf32>
    %254 = arith.mulf %249, %253 : vector<8x12xf32>
    %255 = vector.broadcast %8 : vector<1x32xf32> to vector<12x32xf32>
    %256 = arith.mulf %241, %255 : vector<12x32xf32>
    %cst_58 = arith.constant dense<0.000000e+00> : vector<8x32xf32>
    %257 = tpu.matmul %254, %256, %cst_58 {dimension_numbers = #tpu.dot_dimension_numbers<[1], [0], [0], [1], [0, 0, 1, 1], [], []>} : vector<8x12xf32>, vector<12x32xf32>, vector<8x32xf32> -> vector<8x32xf32>
    %258 = vector.extract_strided_slice %239 {offsets = [0, 8], sizes = [8, 8], strides = [1, 1]} : vector<8x32xf32> to vector<8x8xf32>
    %259 = vector.extract_strided_slice %240 {offsets = [0, 8], sizes = [12, 8], strides = [1, 1]} : vector<12x32xf32> to vector<12x8xf32>
    %cst_59 = arith.constant dense<0.000000e+00> : vector<8x12xf32>
    %260 = tpu.matmul %258, %259, %cst_59 {dimension_numbers = #tpu.dot_dimension_numbers<[1], [1], [0], [0], [0, 0, 1, 0], [], []>} : vector<8x8xf32>, vector<12x8xf32>, vector<8x12xf32> -> vector<8x12xf32>
    %cst_60 = arith.constant dense<0xFF800000> : vector<8xf32>
    %261 = vector.multi_reduction <maximumf>, %260, %cst_60 [1] : vector<8x12xf32> to vector<8xf32>
    %262 = vector.shape_cast %261 : vector<8xf32> to vector<8x1xf32>
    %263 = vector.broadcast %262 : vector<8x1xf32> to vector<8x12xf32>
    %264 = arith.subf %260, %263 : vector<8x12xf32>
    %265 = math.exp %264 : vector<8x12xf32>
    %cst_61 = arith.constant dense<0.000000e+00> : vector<8xf32>
    %266 = vector.multi_reduction <add>, %265, %cst_61 [1] : vector<8x12xf32> to vector<8xf32>
    %267 = vector.shape_cast %266 : vector<8xf32> to vector<8x1xf32>
    %268 = tpu.reciprocal %267 : vector<8x1xf32> -> vector<8x1xf32>
    %269 = vector.broadcast %268 : vector<8x1xf32> to vector<8x12xf32>
    %270 = arith.mulf %265, %269 : vector<8x12xf32>
    %271 = vector.broadcast %15 : vector<1x32xf32> to vector<12x32xf32>
    %272 = arith.mulf %241, %271 : vector<12x32xf32>
    %cst_62 = arith.constant dense<0.000000e+00> : vector<8x32xf32>
    %273 = tpu.matmul %270, %272, %cst_62 {dimension_numbers = #tpu.dot_dimension_numbers<[1], [0], [0], [1], [0, 0, 1, 1], [], []>} : vector<8x12xf32>, vector<12x32xf32>, vector<8x32xf32> -> vector<8x32xf32>
    %274 = arith.addf %257, %273 : vector<8x32xf32>
    %275 = vector.extract_strided_slice %239 {offsets = [0, 16], sizes = [8, 8], strides = [1, 1]} : vector<8x32xf32> to vector<8x8xf32>
    %276 = vector.extract_strided_slice %240 {offsets = [0, 16], sizes = [12, 8], strides = [1, 1]} : vector<12x32xf32> to vector<12x8xf32>
    %cst_63 = arith.constant dense<0.000000e+00> : vector<8x12xf32>
    %277 = tpu.matmul %275, %276, %cst_63 {dimension_numbers = #tpu.dot_dimension_numbers<[1], [1], [0], [0], [0, 0, 1, 0], [], []>} : vector<8x8xf32>, vector<12x8xf32>, vector<8x12xf32> -> vector<8x12xf32>
    %cst_64 = arith.constant dense<0xFF800000> : vector<8xf32>
    %278 = vector.multi_reduction <maximumf>, %277, %cst_64 [1] : vector<8x12xf32> to vector<8xf32>
    %279 = vector.shape_cast %278 : vector<8xf32> to vector<8x1xf32>
    %280 = vector.broadcast %279 : vector<8x1xf32> to vector<8x12xf32>
    %281 = arith.subf %277, %280 : vector<8x12xf32>
    %282 = math.exp %281 : vector<8x12xf32>
    %cst_65 = arith.constant dense<0.000000e+00> : vector<8xf32>
    %283 = vector.multi_reduction <add>, %282, %cst_65 [1] : vector<8x12xf32> to vector<8xf32>
    %284 = vector.shape_cast %283 : vector<8xf32> to vector<8x1xf32>
    %285 = tpu.reciprocal %284 : vector<8x1xf32> -> vector<8x1xf32>
    %286 = vector.broadcast %285 : vector<8x1xf32> to vector<8x12xf32>
    %287 = arith.mulf %282, %286 : vector<8x12xf32>
    %288 = vector.broadcast %22 : vector<1x32xf32> to vector<12x32xf32>
    %289 = arith.mulf %241, %288 : vector<12x32xf32>
    %cst_66 = arith.constant dense<0.000000e+00> : vector<8x32xf32>
    %290 = tpu.matmul %287, %289, %cst_66 {dimension_numbers = #tpu.dot_dimension_numbers<[1], [0], [0], [1], [0, 0, 1, 1], [], []>} : vector<8x12xf32>, vector<12x32xf32>, vector<8x32xf32> -> vector<8x32xf32>
    %291 = arith.addf %274, %290 : vector<8x32xf32>
    %292 = vector.extract_strided_slice %239 {offsets = [0, 24], sizes = [8, 8], strides = [1, 1]} : vector<8x32xf32> to vector<8x8xf32>
    %293 = vector.extract_strided_slice %240 {offsets = [0, 24], sizes = [12, 8], strides = [1, 1]} : vector<12x32xf32> to vector<12x8xf32>
    %cst_67 = arith.constant dense<0.000000e+00> : vector<8x12xf32>
    %294 = tpu.matmul %292, %293, %cst_67 {dimension_numbers = #tpu.dot_dimension_numbers<[1], [1], [0], [0], [0, 0, 1, 0], [], []>} : vector<8x8xf32>, vector<12x8xf32>, vector<8x12xf32> -> vector<8x12xf32>
    %cst_68 = arith.constant dense<0xFF800000> : vector<8xf32>
    %295 = vector.multi_reduction <maximumf>, %294, %cst_68 [1] : vector<8x12xf32> to vector<8xf32>
    %296 = vector.shape_cast %295 : vector<8xf32> to vector<8x1xf32>
    %297 = vector.broadcast %296 : vector<8x1xf32> to vector<8x12xf32>
    %298 = arith.subf %294, %297 : vector<8x12xf32>
    %299 = math.exp %298 : vector<8x12xf32>
    %cst_69 = arith.constant dense<0.000000e+00> : vector<8xf32>
    %300 = vector.multi_reduction <add>, %299, %cst_69 [1] : vector<8x12xf32> to vector<8xf32>
    %301 = vector.shape_cast %300 : vector<8xf32> to vector<8x1xf32>
    %302 = tpu.reciprocal %301 : vector<8x1xf32> -> vector<8x1xf32>
    %303 = vector.broadcast %302 : vector<8x1xf32> to vector<8x12xf32>
    %304 = arith.mulf %299, %303 : vector<8x12xf32>
    %305 = vector.broadcast %29 : vector<1x32xf32> to vector<12x32xf32>
    %306 = arith.mulf %241, %305 : vector<12x32xf32>
    %cst_70 = arith.constant dense<0.000000e+00> : vector<8x32xf32>
    %307 = tpu.matmul %304, %306, %cst_70 {dimension_numbers = #tpu.dot_dimension_numbers<[1], [0], [0], [1], [0, 0, 1, 1], [], []>} : vector<8x12xf32>, vector<12x32xf32>, vector<8x32xf32> -> vector<8x32xf32>
    %308 = arith.addf %291, %307 : vector<8x32xf32>
    %309 = vector.extract_strided_slice %230 {offsets = [8, 0], sizes = [8, 32], strides = [1, 1]} : vector<16x32xf32> to vector<8x32xf32>
    %310 = vector.extract_strided_slice %234 {offsets = [12, 0], sizes = [12, 32], strides = [1, 1]} : vector<24x32xf32> to vector<12x32xf32>
    %311 = vector.extract_strided_slice %238 {offsets = [12, 0], sizes = [12, 32], strides = [1, 1]} : vector<24x32xf32> to vector<12x32xf32>
    %312 = vector.extract_strided_slice %309 {offsets = [0, 0], sizes = [8, 8], strides = [1, 1]} : vector<8x32xf32> to vector<8x8xf32>
    %313 = vector.extract_strided_slice %310 {offsets = [0, 0], sizes = [12, 8], strides = [1, 1]} : vector<12x32xf32> to vector<12x8xf32>
    %cst_71 = arith.constant dense<0.000000e+00> : vector<8x12xf32>
    %314 = tpu.matmul %312, %313, %cst_71 {dimension_numbers = #tpu.dot_dimension_numbers<[1], [1], [0], [0], [0, 0, 1, 0], [], []>} : vector<8x8xf32>, vector<12x8xf32>, vector<8x12xf32> -> vector<8x12xf32>
    %cst_72 = arith.constant dense<0xFF800000> : vector<8xf32>
    %315 = vector.multi_reduction <maximumf>, %314, %cst_72 [1] : vector<8x12xf32> to vector<8xf32>
    %316 = vector.shape_cast %315 : vector<8xf32> to vector<8x1xf32>
    %317 = vector.broadcast %316 : vector<8x1xf32> to vector<8x12xf32>
    %318 = arith.subf %314, %317 : vector<8x12xf32>
    %319 = math.exp %318 : vector<8x12xf32>
    %cst_73 = arith.constant dense<0.000000e+00> : vector<8xf32>
    %320 = vector.multi_reduction <add>, %319, %cst_73 [1] : vector<8x12xf32> to vector<8xf32>
    %321 = vector.shape_cast %320 : vector<8xf32> to vector<8x1xf32>
    %322 = tpu.reciprocal %321 : vector<8x1xf32> -> vector<8x1xf32>
    %323 = vector.broadcast %322 : vector<8x1xf32> to vector<8x12xf32>
    %324 = arith.mulf %319, %323 : vector<8x12xf32>
    %325 = vector.broadcast %8 : vector<1x32xf32> to vector<12x32xf32>
    %326 = arith.mulf %311, %325 : vector<12x32xf32>
    %cst_74 = arith.constant dense<0.000000e+00> : vector<8x32xf32>
    %327 = tpu.matmul %324, %326, %cst_74 {dimension_numbers = #tpu.dot_dimension_numbers<[1], [0], [0], [1], [0, 0, 1, 1], [], []>} : vector<8x12xf32>, vector<12x32xf32>, vector<8x32xf32> -> vector<8x32xf32>
    %328 = vector.extract_strided_slice %309 {offsets = [0, 8], sizes = [8, 8], strides = [1, 1]} : vector<8x32xf32> to vector<8x8xf32>
    %329 = vector.extract_strided_slice %310 {offsets = [0, 8], sizes = [12, 8], strides = [1, 1]} : vector<12x32xf32> to vector<12x8xf32>
    %cst_75 = arith.constant dense<0.000000e+00> : vector<8x12xf32>
    %330 = tpu.matmul %328, %329, %cst_75 {dimension_numbers = #tpu.dot_dimension_numbers<[1], [1], [0], [0], [0, 0, 1, 0], [], []>} : vector<8x8xf32>, vector<12x8xf32>, vector<8x12xf32> -> vector<8x12xf32>
    %cst_76 = arith.constant dense<0xFF800000> : vector<8xf32>
    %331 = vector.multi_reduction <maximumf>, %330, %cst_76 [1] : vector<8x12xf32> to vector<8xf32>
    %332 = vector.shape_cast %331 : vector<8xf32> to vector<8x1xf32>
    %333 = vector.broadcast %332 : vector<8x1xf32> to vector<8x12xf32>
    %334 = arith.subf %330, %333 : vector<8x12xf32>
    %335 = math.exp %334 : vector<8x12xf32>
    %cst_77 = arith.constant dense<0.000000e+00> : vector<8xf32>
    %336 = vector.multi_reduction <add>, %335, %cst_77 [1] : vector<8x12xf32> to vector<8xf32>
    %337 = vector.shape_cast %336 : vector<8xf32> to vector<8x1xf32>
    %338 = tpu.reciprocal %337 : vector<8x1xf32> -> vector<8x1xf32>
    %339 = vector.broadcast %338 : vector<8x1xf32> to vector<8x12xf32>
    %340 = arith.mulf %335, %339 : vector<8x12xf32>
    %341 = vector.broadcast %15 : vector<1x32xf32> to vector<12x32xf32>
    %342 = arith.mulf %311, %341 : vector<12x32xf32>
    %cst_78 = arith.constant dense<0.000000e+00> : vector<8x32xf32>
    %343 = tpu.matmul %340, %342, %cst_78 {dimension_numbers = #tpu.dot_dimension_numbers<[1], [0], [0], [1], [0, 0, 1, 1], [], []>} : vector<8x12xf32>, vector<12x32xf32>, vector<8x32xf32> -> vector<8x32xf32>
    %344 = arith.addf %327, %343 : vector<8x32xf32>
    %345 = vector.extract_strided_slice %309 {offsets = [0, 16], sizes = [8, 8], strides = [1, 1]} : vector<8x32xf32> to vector<8x8xf32>
    %346 = vector.extract_strided_slice %310 {offsets = [0, 16], sizes = [12, 8], strides = [1, 1]} : vector<12x32xf32> to vector<12x8xf32>
    %cst_79 = arith.constant dense<0.000000e+00> : vector<8x12xf32>
    %347 = tpu.matmul %345, %346, %cst_79 {dimension_numbers = #tpu.dot_dimension_numbers<[1], [1], [0], [0], [0, 0, 1, 0], [], []>} : vector<8x8xf32>, vector<12x8xf32>, vector<8x12xf32> -> vector<8x12xf32>
    %cst_80 = arith.constant dense<0xFF800000> : vector<8xf32>
    %348 = vector.multi_reduction <maximumf>, %347, %cst_80 [1] : vector<8x12xf32> to vector<8xf32>
    %349 = vector.shape_cast %348 : vector<8xf32> to vector<8x1xf32>
    %350 = vector.broadcast %349 : vector<8x1xf32> to vector<8x12xf32>
    %351 = arith.subf %347, %350 : vector<8x12xf32>
    %352 = math.exp %351 : vector<8x12xf32>
    %cst_81 = arith.constant dense<0.000000e+00> : vector<8xf32>
    %353 = vector.multi_reduction <add>, %352, %cst_81 [1] : vector<8x12xf32> to vector<8xf32>
    %354 = vector.shape_cast %353 : vector<8xf32> to vector<8x1xf32>
    %355 = tpu.reciprocal %354 : vector<8x1xf32> -> vector<8x1xf32>
    %356 = vector.broadcast %355 : vector<8x1xf32> to vector<8x12xf32>
    %357 = arith.mulf %352, %356 : vector<8x12xf32>
    %358 = vector.broadcast %22 : vector<1x32xf32> to vector<12x32xf32>
    %359 = arith.mulf %311, %358 : vector<12x32xf32>
    %cst_82 = arith.constant dense<0.000000e+00> : vector<8x32xf32>
    %360 = tpu.matmul %357, %359, %cst_82 {dimension_numbers = #tpu.dot_dimension_numbers<[1], [0], [0], [1], [0, 0, 1, 1], [], []>} : vector<8x12xf32>, vector<12x32xf32>, vector<8x32xf32> -> vector<8x32xf32>
    %361 = arith.addf %344, %360 : vector<8x32xf32>
    %362 = vector.extract_strided_slice %309 {offsets = [0, 24], sizes = [8, 8], strides = [1, 1]} : vector<8x32xf32> to vector<8x8xf32>
    %363 = vector.extract_strided_slice %310 {offsets = [0, 24], sizes = [12, 8], strides = [1, 1]} : vector<12x32xf32> to vector<12x8xf32>
    %cst_83 = arith.constant dense<0.000000e+00> : vector<8x12xf32>
    %364 = tpu.matmul %362, %363, %cst_83 {dimension_numbers = #tpu.dot_dimension_numbers<[1], [1], [0], [0], [0, 0, 1, 0], [], []>} : vector<8x8xf32>, vector<12x8xf32>, vector<8x12xf32> -> vector<8x12xf32>
    %cst_84 = arith.constant dense<0xFF800000> : vector<8xf32>
    %365 = vector.multi_reduction <maximumf>, %364, %cst_84 [1] : vector<8x12xf32> to vector<8xf32>
    %366 = vector.shape_cast %365 : vector<8xf32> to vector<8x1xf32>
    %367 = vector.broadcast %366 : vector<8x1xf32> to vector<8x12xf32>
    %368 = arith.subf %364, %367 : vector<8x12xf32>
    %369 = math.exp %368 : vector<8x12xf32>
    %cst_85 = arith.constant dense<0.000000e+00> : vector<8xf32>
    %370 = vector.multi_reduction <add>, %369, %cst_85 [1] : vector<8x12xf32> to vector<8xf32>
    %371 = vector.shape_cast %370 : vector<8xf32> to vector<8x1xf32>
    %372 = tpu.reciprocal %371 : vector<8x1xf32> -> vector<8x1xf32>
    %373 = vector.broadcast %372 : vector<8x1xf32> to vector<8x12xf32>
    %374 = arith.mulf %369, %373 : vector<8x12xf32>
    %375 = vector.broadcast %29 : vector<1x32xf32> to vector<12x32xf32>
    %376 = arith.mulf %311, %375 : vector<12x32xf32>
    %cst_86 = arith.constant dense<0.000000e+00> : vector<8x32xf32>
    %377 = tpu.matmul %374, %376, %cst_86 {dimension_numbers = #tpu.dot_dimension_numbers<[1], [0], [0], [1], [0, 0, 1, 1], [], []>} : vector<8x12xf32>, vector<12x32xf32>, vector<8x32xf32> -> vector<8x32xf32>
    %378 = arith.addf %361, %377 : vector<8x32xf32>
    %379 = tpu.concatenate %308, %378 in 0 : vector<8x32xf32>, vector<8x32xf32> -> vector<16x32xf32>
    %380 = vector.extract_strided_slice %221 {offsets = [0, 96], sizes = [32, 32], strides = [1, 1]} : vector<32x128xf32> to vector<32x32xf32>
    %cst_87 = arith.constant dense<0.000000e+00> : vector<16x32xf32>
    %381 = tpu.matmul %379, %380, %cst_87 {dimension_numbers = #tpu.dot_dimension_numbers<[1], [0], [0], [1], [0, 0, 1, 1], [], []>} : vector<16x32xf32>, vector<32x32xf32>, vector<16x32xf32> -> vector<16x32xf32>
    %382 = vector.extract_strided_slice %222 {offsets = [0, 96], sizes = [1, 32], strides = [1, 1]} : vector<1x128xf32> to vector<1x32xf32>
    %383 = vector.broadcast %382 : vector<1x32xf32> to vector<16x32xf32>
    %384 = arith.addf %381, %383 : vector<16x32xf32>
    %385 = arith.addf %219, %384 : vector<16x32xf32>
    %386 = vector.extract_strided_slice %0 {offsets = [3, 32], sizes = [1, 32], strides = [1, 1]} : vector<8x128xf32> to vector<1x32xf32>
    %387 = vector.extract_strided_slice %0 {offsets = [4, 32], sizes = [1, 32], strides = [1, 1]} : vector<8x128xf32> to vector<1x32xf32>
    %cst_88 = arith.constant dense<0.000000e+00> : vector<16xf32>
    %388 = vector.multi_reduction <add>, %385, %cst_88 [1] : vector<16x32xf32> to vector<16xf32>
    %389 = vector.shape_cast %388 : vector<16xf32> to vector<16x1xf32>
    %cst_89 = arith.constant 3.200000e+01 : f32
    %390 = vector.broadcast %cst_89 : f32 to vector<16x1xf32>
    %391 = arith.divf %389, %390 : vector<16x1xf32>
    %392 = vector.broadcast %391 : vector<16x1xf32> to vector<16x32xf32>
    %393 = arith.subf %385, %392 : vector<16x32xf32>
    %394 = arith.mulf %393, %393 : vector<16x32xf32>
    %cst_90 = arith.constant dense<0.000000e+00> : vector<16xf32>
    %395 = vector.multi_reduction <add>, %394, %cst_90 [1] : vector<16x32xf32> to vector<16xf32>
    %396 = vector.shape_cast %395 : vector<16xf32> to vector<16x1xf32>
    %cst_91 = arith.constant 0.0322580636 : f32
    %397 = vector.broadcast %cst_91 : f32 to vector<16x1xf32>
    %398 = arith.mulf %396, %397 : vector<16x1xf32>
    %399 = math.sqrt %398 : vector<16x1xf32>
    %cst_92 = arith.constant 9.99999996E-13 : f32
    %400 = vector.broadcast %cst_92 : f32 to vector<16x1xf32>
    %401 = arith.addf %399, %400 : vector<16x1xf32>
    %402 = tpu.reciprocal %401 : vector<16x1xf32> -> vector<16x1xf32>
    %403 = vector.broadcast %402 : vector<16x1xf32> to vector<16x32xf32>
    %404 = arith.mulf %393, %403 : vector<16x32xf32>
    %405 = vector.broadcast %386 : vector<1x32xf32> to vector<16x32xf32>
    %406 = arith.mulf %405, %404 : vector<16x32xf32>
    %407 = vector.broadcast %387 : vector<1x32xf32> to vector<16x32xf32>
    %408 = arith.addf %406, %407 : vector<16x32xf32>
    %c0_93 = arith.constant 0 : index
    %c0_94 = arith.constant 0 : index
    %409 = vector.load %arg3[%c0_93, %c0_94] : memref<96x64xf32, #tpu.memory_space<vmem>>, vector<96x64xf32>
    %410 = vector.extract_strided_slice %0 {offsets = [2, 0], sizes = [1, 64], strides = [1, 1]} : vector<8x128xf32> to vector<1x64xf32>
    %411 = vector.extract_strided_slice %0 {offsets = [2, 64], sizes = [1, 32], strides = [1, 1]} : vector<8x128xf32> to vector<1x32xf32>
    %412 = vector.extract_strided_slice %409 {offsets = [0, 0], sizes = [32, 64], strides = [1, 1]} : vector<96x64xf32> to vector<32x64xf32>
    %cst_95 = arith.constant dense<0.000000e+00> : vector<16x64xf32>
    %413 = tpu.matmul %408, %412, %cst_95 {dimension_numbers = #tpu.dot_dimension_numbers<[1], [0], [0], [1], [0, 0, 1, 1], [], []>} : vector<16x32xf32>, vector<32x64xf32>, vector<16x64xf32> -> vector<16x64xf32>
    %414 = vector.broadcast %410 : vector<1x64xf32> to vector<16x64xf32>
    %415 = arith.addf %413, %414 : vector<16x64xf32>
    %cst_96 = arith.constant 0.000000e+00 : f32
    %416 = vector.broadcast %cst_96 : f32 to vector<16x64xf32>
    %417 = arith.maximumf %415, %416 : vector<16x64xf32>
    %418 = vector.extract_strided_slice %409 {offsets = [32, 0], sizes = [64, 32], strides = [1, 1]} : vector<96x64xf32> to vector<64x32xf32>
    %cst_97 = arith.constant dense<0.000000e+00> : vector<16x32xf32>
    %419 = tpu.matmul %417, %418, %cst_97 {dimension_numbers = #tpu.dot_dimension_numbers<[1], [0], [0], [1], [0, 0, 1, 1], [], []>} : vector<16x64xf32>, vector<64x32xf32>, vector<16x32xf32> -> vector<16x32xf32>
    %420 = vector.broadcast %411 : vector<1x32xf32> to vector<16x32xf32>
    %421 = arith.addf %419, %420 : vector<16x32xf32>
    %422 = arith.addf %408, %421 : vector<16x32xf32>
    %423 = vector.extract_strided_slice %0 {offsets = [3, 64], sizes = [1, 32], strides = [1, 1]} : vector<8x128xf32> to vector<1x32xf32>
    %424 = vector.extract_strided_slice %0 {offsets = [4, 64], sizes = [1, 32], strides = [1, 1]} : vector<8x128xf32> to vector<1x32xf32>
    %cst_98 = arith.constant dense<0.000000e+00> : vector<16xf32>
    %425 = vector.multi_reduction <add>, %422, %cst_98 [1] : vector<16x32xf32> to vector<16xf32>
    %426 = vector.shape_cast %425 : vector<16xf32> to vector<16x1xf32>
    %cst_99 = arith.constant 3.200000e+01 : f32
    %427 = vector.broadcast %cst_99 : f32 to vector<16x1xf32>
    %428 = arith.divf %426, %427 : vector<16x1xf32>
    %429 = vector.broadcast %428 : vector<16x1xf32> to vector<16x32xf32>
    %430 = arith.subf %422, %429 : vector<16x32xf32>
    %431 = arith.mulf %430, %430 : vector<16x32xf32>
    %cst_100 = arith.constant dense<0.000000e+00> : vector<16xf32>
    %432 = vector.multi_reduction <add>, %431, %cst_100 [1] : vector<16x32xf32> to vector<16xf32>
    %433 = vector.shape_cast %432 : vector<16xf32> to vector<16x1xf32>
    %cst_101 = arith.constant 0.0322580636 : f32
    %434 = vector.broadcast %cst_101 : f32 to vector<16x1xf32>
    %435 = arith.mulf %433, %434 : vector<16x1xf32>
    %436 = math.sqrt %435 : vector<16x1xf32>
    %cst_102 = arith.constant 9.99999996E-13 : f32
    %437 = vector.broadcast %cst_102 : f32 to vector<16x1xf32>
    %438 = arith.addf %436, %437 : vector<16x1xf32>
    %439 = tpu.reciprocal %438 : vector<16x1xf32> -> vector<16x1xf32>
    %440 = vector.broadcast %439 : vector<16x1xf32> to vector<16x32xf32>
    %441 = arith.mulf %430, %440 : vector<16x32xf32>
    %442 = vector.broadcast %423 : vector<1x32xf32> to vector<16x32xf32>
    %443 = arith.mulf %442, %441 : vector<16x32xf32>
    %444 = vector.broadcast %424 : vector<1x32xf32> to vector<16x32xf32>
    %445 = arith.addf %443, %444 : vector<16x32xf32>
    %c0_103 = arith.constant 0 : index
    %c0_104 = arith.constant 0 : index
    %446 = vector.load %arg5[%c0_103, %c0_104] : memref<16x32xf32, #tpu.memory_space<vmem>>, vector<16x32xf32>
    tpu.vector_store %arg5[%c0_103, %c0_104], %445 {strides = array<i32>} : memref<16x32xf32, #tpu.memory_space<vmem>>, vector<16x32xf32>,
    return
  }
}

</mosaic_0001>

<bundles_post_ra>
// kernel: decoder_layer.1
= control target key start
LH: loop header
LB: loop body
LE: loop exit
PB: predicated region body
PF: predicated region fallthrough
CT: control target
= control target key end

     0   :  { %vm53_vm0 = vcmask 261120   ;;  %s5304_s0 = inlined_call_operand.vmem [shape: f32[16,32], index: 0, kind: input, shape index: {}]   ;;  %s5305_s1 = inlined_call_operand.vmem [shape: f32[24,32], index: 1, kind: input, shape index: {}]   ;;  %s5306_s2 = inlined_call_operand.vmem [shape: f32[2,32,128], index: 2, kind: input, shape index: {}]   ;;  %s5307_s3 = inlined_call_operand.vmem [shape: f32[96,64], index: 3, kind: input, shape index: {}]   ;;  %s5308_s4 = inlined_call_operand.vmem [shape: f32[8,128], index: 4, kind: input, shape index: {}]   ;;  %s5309_s5 = inlined_call_operand.hbm [shape: f32[16,32], index: 5, kind: output, shape index: {}]  }
   0x1   :  { %v4650_v0 = vld [vmem:[%s5306_s2] sm:$0xff]  ;;  %v4655_v1 = vld [vmem:[%s5306_s2 + $0x8] sm:$0xff]  ;;  %v4660_v2 = vld [vmem:[%s5306_s2 + $0x10] sm:$0xff] }
   0x2   :  { %v4388_v3 = vpack.i.bf16 %v4655_v1, %v4650_v0  ;;  %v4217_v4 = vpack.c.bf16 %v4655_v1, %v4650_v0  ;;  %v4669_v5 = vld [vmem:[%s5306_s2 + $0x18] sm:$0xff]  ;;  %v4674_v6 = vld [vmem:[%s5304_s0] sm:$0xff] }
   0x3   :  { %v4221_v7 = vpack.c.bf16 %v4669_v5, %v4660_v2  ;;  %3942 = vmatprep.mubr.msk.f32.mxu1 %vm53_vm0, %v4674_v6 }
   0x4   :  { %10 = vsyncpa [#allocation3], 0  ;;  %4218 = vmatprep.subr.bf16.mxu1 %v4217_v4  ;;  %v4683_v8 = vld [vmem:[%s5304_s0 + $0x8] sm:$0xff]  ;;  %v4601_v9 = vmov 0.0   ;;  %v22_v10 = vlaneseq  ;;  %vm4602_vm1 = vmmov 0   ;;  %v4699_v13 = vld [vmem:[%s5308_s4] sm:$0xff] }
   0x5   :  { %4220 = vmatpush3.bf16.msra.mxu1 %v4217_v4  ;;  %3955 = vmatprep.subr.mxu0 %v4601_v9  ;;  %s4603_s6 = smov 96   ;;  %s4604_s7 = smov 120   ;;  %vm146_vm2 = vcmask 64512   ;;  %vm2044_vm13 = vcmask 1043456  }
   0x6   :  { %4222 = vmatprep.subr.bf16.mxu1 %v4221_v7  ;;  %v4689_v11 = vshrl.u32 %v22_v10, 7  ;;  %3957 = vmatprep.mubr.msk.f32.mxu0 %vm4602_vm1, %v4601_v9  ;;  %s4605_s8 = smov 88   ;;  %v4727_v28 = vand.u32 127, %v22_v10  ;;  %s4606_s9 = smov 64  }
   0x7   :  { %s4607_s10 = smov 112   ;;  %s4608_s11 = smov 104  }
   0x8   :  { %v137_v12 = vsub.s32 0, %v4689_v11  ;;  %vm29_vm3 = vcmp.ge.s32.totalorder %v4727_v28, 8  ;;  %vm30_vm4 = vcmp.lt.s32.totalorder %v4727_v28, 16  ;;  %vm25_vm5 = vcmp.lt.s32.totalorder %v4727_v28, 8  ;;  %s4609_s12 = smov 80   ;;  %s4610_s13 = smov 72  }
   0x9   :  { %4224 = vmatpush3.bf16.msra.mxu1 %v4221_v7  ;;  %vm31_vm6 = vmand %vm29_vm3, %vm30_vm4  ;;  %v3720_v29 = vsel %vm25_vm5, 1.0, %v4601_v9  ;;  %vm34_vm7 = vcmp.ge.s32.totalorder %v4727_v28, 16  ;;  %vm35_vm8 = vcmp.lt.s32.totalorder %v4727_v28, 24  ;;  %vm39_vm9 = vcmp.ge.s32.totalorder %v4727_v28, 24  ;;  %s4611_s14 = smov 32  }
   0xa   :  { %3945 = vmatprep.subr.mxu1 %v4601_v9  ;;  %v4702_v14 = vrot.slane %v4699_v13, %v137_v12  ;;  %v3721_v30 = vsel %vm31_vm6, 1.0, %v4601_v9  ;;  %vm40_vm10 = vcmp.lt.s32.totalorder %v4727_v28, 32  ;;  %vm36_vm11 = vmand %vm34_vm7, %vm35_vm8  ;;  %vm1925_vm6 = vcmask 97280  }
   0xb   :  { %vm41_vm12 = vmand %vm39_vm9, %vm40_vm10  ;;  %vm4613_vm7 = vmmov 1  }
   0xc   :  { %3943 = vmatmul.mubr.msk.f32.vlgmr.msra.gmra.mrb[0].mxu1 %vm53_vm0, %v4683_v8  ;;  %vm5017_vm5 = vmpackc.low %vm146_vm2, %vm146_vm2 }
   0xd   :  { %3947 = vmatprep.mubr.msk.f32.mxu1 %vm4602_vm1, %v4601_v9  ;;  %vm5090_vm8 = vmpackc.low %vm2044_vm13, %vm4613_vm7 }
  0xdf   :  { %v4704_v15 = vpop.f32.mrb[0].mxu1 }
  0xe0   :  { %v126_v16 = vpop.f32.mrb[1].mxu1  ;;  %v4754_v45 = vadd.f32 %v4704_v15, %v4702_v14 }
  0xe1   :  { %v4707_v17 = vadd.f32 %v4702_v14, %v126_v16 }
  0xe2   :  { %v142_v46 = vmul.f32 0.35355338, %v4754_v45 }
  0xe3   :  { %144 = vrot.lane.b32.xlu0 %v4707_v17, %s4603_s6  ;;  %v141_v18 = vmul.f32 0.35355338, %v4707_v17 }
  0xe5   :  { %238 = vrot.lane.b32.xlu1 %v141_v18, %s4604_s7 }
  0xe7   :  { %240 = vrot.lane.b32.xlu0 %v4707_v17, %s4605_s8 }
 0x155   :  { %v145_v19 = vpop.permute.xlu0 %144 }
 0x156   :  { %3946 = vmatpush3.xpose.msk.msra.mxu1 %vm146_vm2, %v145_v19 }
 0x157   :  { %3950 = vmatprep.subr.mxu1 %v4601_v9  ;;  %v239_v21 = vpop.permute.xlu1 %238 }
 0x159   :  { %v241_v20 = vpop.permute.xlu0 %240  ;;  %3948 = vmatmul.mubr.msk.f32.vlgmr.msra.gmra.mrb[2].mxu1 %vm146_vm2, %v141_v18 }
 0x15a   :  { %3951 = vmatpush3.xpose.msk.msra.mxu1 %vm146_vm2, %v241_v20  ;;  %3952 = vmatprep.mubr.msk.f32.mxu1 %vm4602_vm1, %v4601_v9 }
 0x15b   :  { %3975 = vmatprep.subr.mxu1 %v4601_v9 }
 0x15d   :  { %3953 = vmatmul.mubr.msk.f32.vlgmr.msra.gmra.mrb[4].mxu1 %vm146_vm2, %v239_v21 }
 0x15e   :  { %3977 = vmatprep.mubr.msk.f32.mxu1 %vm4602_vm1, %v4601_v9 }
 0x22c   :  { %v218_v22 = vpop.f32.mrb[2].mxu1 }
 0x22d   :  { %v3949_v23 = vpop.f32.mrb[3].mxu1  ;;  %v222_v24 = vsel %vm146_vm2, %v218_v22, -inf }
 0x22e   :  { %223 = vmax.xlane.f32.xlu0 %v222_v24 }
 0x230   :  { %v312_v25 = vpop.f32.mrb[4].mxu1 }
 0x231   :  { %v3954_v26 = vpop.f32.mrb[5].mxu1  ;;  %v316_v27 = vsel %vm146_vm2, %v312_v25, -inf }
 0x232   :  { %317 = vmax.xlane.f32.xlu1 %v316_v27 }
 0x243   :  { %234 = vrot.lane.b32.xlu1 %v3720_v29, %s4606_s9 }
 0x244   :  { %328 = vrot.lane.b32.xlu0 %v3721_v30, %s4606_s9 }
 0x2bb   :  { %v224_v31 = vpop.xlane.xlu0 %223 }
 0x2bc   :  { %v225_v37 = vsub.f32 %v218_v22, %v224_v31 }
 0x2be   :  { %v226_v38 = vmul.f32 1.442695, %v225_v37 }
 0x2bf   :  { %v4736_v32 = vpop.permute.xlu0 %328  ;;  %v318_v33 = vpop.xlane.xlu1 %317 }
 0x2c0   :  { %v331_v34 = vmul.f32 %v4736_v32, %v4707_v17  ;;  %4488 = vpow2.f32 %v226_v38  ;;  %v319_v39 = vsub.f32 %v312_v25, %v318_v33  ;;  %v3722_v33 = vsel %vm36_vm11, 1.0, %v4601_v9 }
 0x2c1   :  { %vm3534_vm11 = vcmask 523264  }
 0x2c2   :  { %333 = vrot.lane.b32.xlu0 %v331_v34, %s4606_s9  ;;  %v320_v40 = vmul.f32 1.442695, %v319_v39  ;;  %v3723_v34 = vsel %vm41_vm12, 1.0, %v4601_v9 }
 0x2c3   :  { %v4741_v35 = vpop.permute.xlu1 %234  ;;  %v4383_v37 = vpack.i.bf16 %v3723_v34, %v3722_v33 }
 0x2c4   :  { %v237_v36 = vmul.f32 %v4741_v35, %v4707_v17  ;;  %4490 = vpow2.f32 %v320_v40 }
 0x2c6   :  { %410 = vrot.lane.b32.xlu1 %v237_v36, %s4606_s9 }
 0x2ca   :  { %v4489_v41 = vpop.eup %4488 }
 0x2cb   :  { %v228_v42 = vsel %vm146_vm2, %v4489_v41, 0.0 }
 0x2ce   :  { %v4491_v43 = vpop.eup %4490 }
 0x2cf   :  { %v322_v44 = vsel %vm146_vm2, %v4491_v43, 0.0 }
 0x2e1   :  { %229 = vadd.xlane.f32.xlu0 %v228_v42 }
 0x2ea   :  { %323 = vadd.xlane.f32.xlu1 %v322_v44 }
 0x2f7   :  { %486 = vrot.lane.b32.xlu0 %v141_v18, %s4607_s10 }
 0x2fb   :  { %658 = vrot.lane.b32.xlu0 %v141_v18, %s4608_s11  ;;  %488 = vrot.lane.b32.xlu1 %v4707_v17, %s4609_s12 }
 0x2ff   :  { %922 = vrot.lane.b32.xlu0 %v4754_v45, %s4605_s8  ;;  %660 = vrot.lane.b32.xlu1 %v4707_v17, %s4610_s13 }
 0x303   :  { %1166 = vrot.lane.b32.xlu0 %v4754_v45, %s4609_s12  ;;  %831 = vrot.lane.b32.xlu1 %v4754_v45, %s4603_s6 }
 0x307   :  { %1334 = vrot.lane.b32.xlu0 %v4754_v45, %s4610_s13  ;;  %920 = vrot.lane.b32.xlu1 %v142_v46, %s4604_s7 }
 0x30b   :  { %1164 = vrot.lane.b32.xlu1 %v142_v46, %s4607_s10 }
 0x30f   :  { %1332 = vrot.lane.b32.xlu1 %v142_v46, %s4608_s11 }
 0x334   :  { %v334_v47 = vpop.permute.xlu0 %333 }
 0x335   :  { %3956 = vmatpush3.msra.mxu0 %v334_v47 }
 0x336   :  { %3960 = vmatprep.subr.mxu0 %v4601_v9 }
 0x338   :  { %v411_v49 = vpop.permute.xlu1 %410 }
 0x36e   :  { %v230_v48 = vpop.xlane.xlu0 %229 }
 0x372   :  { %v487_v50 = vpop.permute.xlu0 %486 }
 0x376   :  { %v659_v53 = vpop.permute.xlu0 %658 }
 0x377   :  { %v324_v51 = vpop.xlane.xlu1 %323 }
 0x378   :  { %4492 = vrcp.f32 %v324_v51 }
 0x379   :  { %4494 = vrcp.f32 %v230_v48 }
 0x37a   :  { %v923_v56 = vpop.permute.xlu0 %922 }
 0x37b   :  { %v489_v52 = vpop.permute.xlu1 %488 }
 0x37e   :  { %v1167_v61 = vpop.permute.xlu0 %1166 }
 0x37f   :  { %v661_v54 = vpop.permute.xlu1 %660 }
 0x380   :  { %3976 = vmatpush3.xpose.msk.msra.mxu1 %vm146_vm2, %v661_v54 }
 0x381   :  { %3985 = vmatprep.subr.mxu1 %v4601_v9 }
 0x382   :  { %v4493_v55 = vpop.eup %4492  ;;  %v1335_v4 = vpop.permute.xlu0 %1334 }
 0x383   :  { %3978 = vmatmul.mubr.msk.f32.vlgmr.msra.gmra.mrb[6].mxu1 %vm146_vm2, %v659_v53  ;;  %v832_v57 = vpop.permute.xlu1 %831  ;;  %v326_v58 = vmul.f32 %v4493_v55, %v4491_v43  ;;  %v4495_v60 = vpop.eup %4494 }
 0x384   :  { %3986 = vmatpush3.xpose.msk.msra.mxu1 %vm146_vm2, %v832_v57  ;;  %3987 = vmatprep.mubr.msk.f32.mxu1 %vm4602_vm1, %v4601_v9  ;;  %v232_v62 = vmul.f32 %v4495_v60, %v4489_v41 }
 0x385   :  { %3958 = vmatmul.mubr.msk.f32.vlgmr.msra.gmra.mrb[0].mxu0 %vm146_vm2, %v326_v58  ;;  %3990 = vmatprep.subr.mxu1 %v4601_v9 }
 0x386   :  { %3961 = vmatpush3.msra.mxu0 %v411_v49  ;;  %3962 = vmatprep.mubr.msk.f32.mxu0 %vm4602_vm1, %v4601_v9 }
 0x387   :  { %3988 = vmatmul.mubr.msk.f32.vlgmr.msra.gmra.mrb[8].mxu1 %vm146_vm2, %v142_v46  ;;  %v921_v59 = vpop.permute.xlu1 %920  ;;  %3965 = vmatprep.subr.mxu0 %v4601_v9 }
 0x388   :  { %3991 = vmatpush3.xpose.msk.msra.mxu1 %vm146_vm2, %v923_v56  ;;  %3992 = vmatprep.mubr.msk.f32.mxu1 %vm4602_vm1, %v4601_v9 }
 0x389   :  { %4005 = vmatprep.subr.mxu1 %v4601_v9 }
 0x38b   :  { %3993 = vmatmul.mubr.msk.f32.vlgmr.msra.gmra.mrb[10].mxu1 %vm146_vm2, %v921_v59  ;;  %v1165_v63 = vpop.permute.xlu1 %1164 }
 0x38c   :  { %4006 = vmatpush3.xpose.msk.msra.mxu1 %vm146_vm2, %v1167_v61  ;;  %4007 = vmatprep.mubr.msk.f32.mxu1 %vm4602_vm1, %v4601_v9 }
 0x38d   :  { %3963 = vmatmul.mubr.msk.f32.vlgmr.msra.gmra.mrb[0].mxu0 %vm146_vm2, %v232_v62  ;;  %4015 = vmatprep.subr.mxu1 %v4601_v9  ;;  %v1009_v62 = vmul.f32 %v4736_v32, %v4754_v45 }
 0x38e   :  { %3966 = vmatpush3.xpose.msk.msra.mxu0 %vm146_vm2, %v489_v52  ;;  %3967 = vmatprep.mubr.msk.f32.mxu0 %vm4602_vm1, %v4601_v9 }
 0x38f   :  { %4008 = vmatmul.mubr.msk.f32.vlgmr.msra.gmra.mrb[12].mxu1 %vm146_vm2, %v1165_v63  ;;  %3970 = vmatprep.subr.mxu0 %v4601_v9  ;;  %v1333_v7 = vpop.permute.xlu1 %1332 }
 0x390   :  { %4016 = vmatpush3.xpose.msk.msra.mxu1 %vm146_vm2, %v1335_v4  ;;  %4017 = vmatprep.mubr.msk.f32.mxu1 %vm4602_vm1, %v4601_v9 }
 0x391   :  { %3968 = vmatmul.mubr.msk.f32.vlgmr.msra.gmra.mrb[2].mxu0 %vm146_vm2, %v487_v50 }
 0x392   :  { %3972 = vmatprep.mubr.msk.f32.mxu0 %vm4602_vm1, %v4601_v9 }
 0x393   :  { %4018 = vmatmul.mubr.msk.f32.vlgmr.msra.gmra.mrb[14].mxu1 %vm146_vm2, %v1333_v7 }
 0x456   :  { %v732_v10 = vpop.f32.mrb[6].mxu1 }
 0x457   :  { %v3979_v12 = vpop.f32.mrb[7].mxu1  ;;  %v736_v15 = vsel %vm146_vm2, %v732_v10, -inf }
 0x458   :  { %737 = vmax.xlane.f32.xlu1 %v736_v15 }
 0x45a   :  { %v904_v16 = vpop.f32.mrb[8].mxu1 }
 0x45b   :  { %v3989_v18 = vpop.f32.mrb[9].mxu1  ;;  %v908_v31 = vsel %vm146_vm2, %v904_v16, -inf }
 0x45e   :  { %v994_v19 = vpop.f32.mrb[10].mxu1 }
 0x45f   :  { %v3994_v20 = vpop.f32.mrb[11].mxu1  ;;  %v998_v30 = vsel %vm146_vm2, %v994_v19, -inf }
 0x462   :  { %v1238_v21 = vpop.f32.mrb[12].mxu1 }
 0x463   :  { %v4009_v22 = vpop.f32.mrb[13].mxu1  ;;  %v1242_v23 = vsel %vm146_vm2, %v1238_v21, -inf }
 0x464   :  { %v560_v24 = vpop.f32.mrb[2].mxu0  ;;  %1243 = vmax.xlane.f32.xlu1 %v1242_v23  ;;  %v919_v23 = vmul.f32 %v4741_v35, %v4754_v45 }
 0x465   :  { %v3969_v25 = vpop.f32.mrb[3].mxu0  ;;  %v564_v26 = vsel %vm146_vm2, %v560_v24, -inf }
 0x466   :  { %565 = vmax.xlane.f32.xlu0 %v564_v26  ;;  %v1406_v27 = vpop.f32.mrb[14].mxu1 }
 0x467   :  { %v4019_v29 = vpop.f32.mrb[15].mxu1  ;;  %v1410_v36 = vsel %vm146_vm2, %v1406_v27, -inf }
 0x46a   :  { %999 = vmax.xlane.f32.xlu0 %v998_v30 }
 0x46e   :  { %909 = vmax.xlane.f32.xlu0 %v908_v31 }
 0x472   :  { %1411 = vmax.xlane.f32.xlu0 %v1410_v36 }
 0x475   :  { %4384 = vrot.lane.b32.xlu1 %v4383_v37, %s4606_s9 }
 0x4e5   :  { %v738_v38 = vpop.xlane.xlu1 %737 }
 0x4e6   :  { %v739_v28 = vsub.f32 %v732_v10, %v738_v38 }
 0x4e8   :  { %v740_v39 = vmul.f32 1.442695, %v739_v28 }
 0x4ea   :  { %4496 = vpow2.f32 %v740_v39 }
 0x4f1   :  { %v1244_v40 = vpop.xlane.xlu1 %1243 }
 0x4f2   :  { %v1245_v53 = vsub.f32 %v1238_v21, %v1244_v40 }
 0x4f3   :  { %v566_v41 = vpop.xlane.xlu0 %565 }
 0x4f4   :  { %v4818_v42 = vpop.eup %4496  ;;  %v567_v43 = vsub.f32 %v560_v24, %v566_v41  ;;  %v1246_v58 = vmul.f32 1.442695, %v1245_v53  ;;  %v4393_v24 = vpack.i.bf16 %v4669_v5, %v4660_v2 }
 0x4f5   :  { %v4385_v44 = vpop.permute.xlu1 %4384  ;;  %v742_v46 = vsel %vm146_vm2, %v4818_v42, 0.0 }
 0x4f6   :  { %v568_v47 = vmul.f32 1.442695, %v567_v43  ;;  %v4822_v48 = vunpack.i.l.bf16 %v4385_v44  ;;  %743 = vadd.xlane.f32.xlu0 %v742_v46  ;;  %v4824_v50 = vunpack.i.h.bf16 %v4385_v44 }
 0x4f7   :  { %v1000_v49 = vpop.xlane.xlu0 %999 }
 0x4f8   :  { %4498 = vpow2.f32 %v568_v47  ;;  %v1001_v51 = vsub.f32 %v994_v19, %v1000_v49  ;;  %v579_v52 = vmul.f32 %v4822_v48, %v4707_v17  ;;  %v751_v57 = vmul.f32 %v4824_v50, %v4707_v17 }
 0x4f9   :  { %v1253_v17 = vmul.f32 %v4822_v48, %v4754_v45  ;;  %v1421_v15 = vmul.f32 %v4824_v50, %v4754_v45 }
 0x4fa   :  { %v1002_v54 = vmul.f32 1.442695, %v1001_v51  ;;  %581 = vrot.lane.b32.xlu1 %v579_v52, %s4606_s9 }
 0x4fb   :  { %v910_v55 = vpop.xlane.xlu0 %909 }
 0x4fc   :  { %4500 = vpow2.f32 %v1002_v54  ;;  %v911_v56 = vsub.f32 %v904_v16, %v910_v55  ;;  %v4883_v55 = vld [vmem:[%s5306_s2 + $0x20] sm:$0xff] }
 0x4fe   :  { %v912_v59 = vmul.f32 1.442695, %v911_v56  ;;  %753 = vrot.lane.b32.xlu1 %v751_v57, %s4606_s9  ;;  %v4888_v56 = vld [vmem:[%s5306_s2 + $0x28] sm:$0xff] }
 0x4ff   :  { %v1412_v60 = vpop.xlane.xlu0 %1411  ;;  %v4233_v57 = vpack.c.bf16 %v4888_v56, %v4883_v55 }
 0x500   :  { %4502 = vpow2.f32 %v912_v59  ;;  %v1413_v61 = vsub.f32 %v1406_v27, %v1412_v60  ;;  %v4896_v59 = vld [vmem:[%s5306_s2 + $0x30] sm:$0xff]  ;;  %v4901_v60 = vld [vmem:[%s5306_s2 + $0x38] sm:$0xff] }
 0x501   :  { %4504 = vpow2.f32 %v1246_v58  ;;  %v4612_v58 = vmov 0.0|0.0  }
 0x502   :  { %v4499_v63 = vpop.eup %4498  ;;  %v1414_v4 = vmul.f32 1.442695, %v1413_v61  ;;  %1011 = vrot.lane.b32.xlu1 %v1009_v62, %s4606_s9  ;;  %v4237_v61 = vpack.c.bf16 %v4901_v60, %v4896_v59 }
 0x503   :  { %v570_v7 = vsel %vm146_vm2, %v4499_v63, 0.0 }
 0x504   :  { %571 = vadd.xlane.f32.xlu0 %v570_v7  ;;  %4506 = vpow2.f32 %v1414_v4 }
 0x506   :  { %v4501_v10 = vpop.eup %4500  ;;  %1255 = vrot.lane.b32.xlu1 %v1253_v17, %s4606_s9  ;;  %v46_v17 = vld [vmem:[%s5305_s1] sm:$0xff] }
 0x507   :  { %v1004_v12 = vsel %vm146_vm2, %v4501_v10, 0.0 }
 0x508   :  { %1005 = vadd.xlane.f32.xlu0 %v1004_v12  ;;  %v48_v12 = vld [vmem:[%s5305_s1 + $0x10] sm:$0xff] }
 0x50a   :  { %v4503_v16 = vpop.eup %4502  ;;  %1423 = vrot.lane.b32.xlu1 %v1421_v15, %s4606_s9 }
 0x50b   :  { %v914_v18 = vsel %vm146_vm2, %v4503_v16, 0.0  ;;  %v4505_v19 = vpop.eup %4504 }
 0x50c   :  { %915 = vadd.xlane.f32.xlu0 %v914_v18  ;;  %v1248_v20 = vsel %vm146_vm2, %v4505_v19, 0.0 }
 0x50e   :  { %v4507_v21 = vpop.eup %4506  ;;  %4389 = vrot.lane.b32.xlu1 %v4388_v3, %s4611_s14 }
 0x50f   :  { %v1416_v22 = vsel %vm146_vm2, %v4507_v21, 0.0 }
 0x510   :  { %1249 = vadd.xlane.f32.xlu0 %v1248_v20 }
 0x512   :  { %4394 = vrot.lane.b32.xlu1 %v4393_v24, %s4611_s14 }
 0x514   :  { %1417 = vadd.xlane.f32.xlu0 %v1416_v22 }
 0x516   :  { %1517 = vrot.lane.b32.xlu1 %v4702_v14, %s4611_s14 }
 0x52a   :  { %1088 = vrot.lane.b32.xlu0 %v919_v23, %s4606_s9 }
 0x56c   :  { %v582_v25 = vpop.permute.xlu1 %581 }
 0x56d   :  { %3971 = vmatpush3.msra.mxu0 %v582_v25  ;;  %v1833_v25 = vsub.s32 1, %v4689_v11 }
 0x56e   :  { %3980 = vmatprep.subr.mxu0 %v4601_v9 }
 0x570   :  { %v754_v3 = vpop.permute.xlu1 %753 }
 0x574   :  { %v1012_v33 = vpop.permute.xlu1 %1011 }
 0x578   :  { %v1256_v28 = vpop.permute.xlu1 %1255 }
 0x57c   :  { %v1424_v41 = vpop.permute.xlu1 %1423 }
 0x580   :  { %v4390_v44 = vpop.permute.xlu1 %4389 }
 0x581   :  { %v4392_v46 = vunpack.i.h.bf16 %v4390_v44  ;;  %v4391_v47 = vunpack.i.l.bf16 %v4390_v44 }
 0x583   :  { %v744_v45 = vpop.xlane.xlu0 %743  ;;  %v4225_v49 = vpack.c.bf16 %v4392_v46, %v4391_v47 }
 0x584   :  { %v4395_v51 = vpop.permute.xlu1 %4394 }
 0x585   :  { %v4397_v52 = vunpack.i.h.bf16 %v4395_v51  ;;  %v4396_v53 = vunpack.i.l.bf16 %v4395_v51  ;;  %4226 = vmatprep.subr.bf16.mxu1 %v4225_v49 }
 0x586   :  { %4228 = vmatpush3.bf16.msra.mxu1 %v4225_v49 }
 0x587   :  { %v4229_v54 = vpack.c.bf16 %v4397_v52, %v4396_v53 }
 0x588   :  { %v1518_v15 = vpop.permute.xlu1 %1517 }
 0x589   :  { %4230 = vmatprep.subr.bf16.mxu1 %v4229_v54 }
 0x58a   :  { %4232 = vmatpush3.bf16.msra.mxu1 %v4229_v54 }
 0x58b   :  { %4241 = vmatprep.subr.bf16.mxu1 %v4612_v58 }
 0x591   :  { %v572_v26 = vpop.xlane.xlu0 %571 }
 0x592   :  { %4508 = vrcp.f32 %v572_v26 }
 0x593   :  { %4510 = vrcp.f32 %v744_v45 }
 0x595   :  { %v1006_v27 = vpop.xlane.xlu0 %1005 }
 0x596   :  { %4512 = vrcp.f32 %v1006_v27  ;;  %v4936_v27 = vrot.slane %v4699_v13, %v1833_v25 }
 0x599   :  { %v916_v29 = vpop.xlane.xlu0 %915 }
 0x59a   :  { %4514 = vrcp.f32 %v916_v29 }
 0x59c   :  { %v4509_v0 = vpop.eup %4508 }
 0x59d   :  { %v574_v1 = vmul.f32 %v4509_v0, %v4499_v63  ;;  %v1250_v2 = vpop.xlane.xlu0 %1249  ;;  %v4511_v5 = vpop.eup %4510 }
 0x59e   :  { %v746_v14 = vmul.f32 %v4511_v5, %v4818_v42  ;;  %4516 = vrcp.f32 %v1250_v2 }
 0x59f   :  { %3973 = vmatmul.mubr.msk.f32.vlgmr.msra.gmra.mrb[0].mxu0 %vm146_vm2, %v574_v1 }
 0x5a0   :  { %3981 = vmatpush3.msra.mxu0 %v754_v3  ;;  %3982 = vmatprep.mubr.msk.f32.mxu0 %vm4602_vm1, %v4601_v9  ;;  %v4513_v31 = vpop.eup %4512 }
 0x5a1   :  { %3995 = vmatprep.subr.mxu0 %v4601_v9  ;;  %v1418_v30 = vpop.xlane.xlu0 %1417  ;;  %v1008_v34 = vmul.f32 %v4513_v31, %v4501_v10  ;;  %v47_v10 = vld [vmem:[%s5305_s1 + $0x8] sm:$0xff] }
 0x5a2   :  { %4518 = vrcp.f32 %v1418_v30 }
 0x5a4   :  { %v4515_v37 = vpop.eup %4514 }
 0x5a5   :  { %v1089_v36 = vpop.permute.xlu0 %1088  ;;  %v918_v38 = vmul.f32 %v4515_v37, %v4503_v16 }
 0x5a7   :  { %3983 = vmatmul.mubr.msk.f32.vlgmr.msra.gmra.mrb[0].mxu0 %vm146_vm2, %v746_v14 }
 0x5a8   :  { %3996 = vmatpush3.msra.mxu0 %v1012_v33  ;;  %3997 = vmatprep.mubr.msk.f32.mxu0 %vm4602_vm1, %v4601_v9  ;;  %v4517_v39 = vpop.eup %4516 }
 0x5a9   :  { %4000 = vmatprep.subr.mxu0 %v4601_v9  ;;  %v1252_v40 = vmul.f32 %v4517_v39, %v4505_v19 }
 0x5ab   :  { %3998 = vmatmul.mubr.msk.f32.vlgmr.msra.gmra.mrb[4].mxu0 %vm146_vm2, %v1008_v34 }
 0x5ac   :  { %4001 = vmatpush3.msra.mxu0 %v1089_v36  ;;  %4002 = vmatprep.mubr.msk.f32.mxu0 %vm4602_vm1, %v4601_v9  ;;  %v4519_v42 = vpop.eup %4518 }
 0x5ad   :  { %4010 = vmatprep.subr.mxu0 %v4601_v9  ;;  %v1420_v43 = vmul.f32 %v4519_v42, %v4507_v21 }
 0x5b3   :  { %4003 = vmatmul.mubr.msk.f32.vlgmr.msra.gmra.mrb[4].mxu0 %vm146_vm2, %v918_v38 }
 0x5b4   :  { %4011 = vmatpush3.msra.mxu0 %v1256_v28  ;;  %4012 = vmatprep.mubr.msk.f32.mxu0 %vm4602_vm1, %v4601_v9 }
 0x5b5   :  { %4020 = vmatprep.subr.mxu0 %v4601_v9 }
 0x5bb   :  { %4013 = vmatmul.mubr.msk.f32.vlgmr.msra.gmra.mrb[4].mxu0 %vm146_vm2, %v1252_v40 }
 0x5bc   :  { %4021 = vmatpush3.msra.mxu0 %v1424_v41  ;;  %4022 = vmatprep.mubr.msk.f32.mxu0 %vm4602_vm1, %v4601_v9 }
 0x5bd   :  { %4234 = vmatprep.subr.bf16.mxu0 %v4233_v57 }
 0x5c3   :  { %4023 = vmatmul.mubr.msk.f32.vlgmr.msra.gmra.mrb[4].mxu0 %vm146_vm2, %v1420_v43 }
 0x5c4   :  { %4236 = vmatpush3.bf16.msra.mxu0 %v4233_v57 }
 0x5c5   :  { %4238 = vmatprep.subr.bf16.mxu0 %v4237_v61 }
 0x5c8   :  { %4240 = vmatpush3.bf16.msra.mxu0 %v4237_v61 }
 0x5c9   :  { %4247 = vmatprep.subr.bf16.mxu0 %v4612_v58 }
 0x67a   :  { %v825_v62 = vpop.f32.mrb[0].mxu0 }
 0x67b   :  { %v3984_v63 = vpop.f32.mrb[1].mxu0  ;;  %4033 = vmatprep.mubr.msk.f32.mxu1 %vm53_vm0, %v825_v62 }
 0x696   :  { %v1495_v4 = vpop.f32.mrb[4].mxu0 }
 0x697   :  { %v4024_v7 = vpop.f32.mrb[5].mxu0  ;;  %4034 = vmatmul.mubr.msk.f32.vlgmr.msra.gmra.mrb[16].mxu1 %vm53_vm0, %v1495_v4 }
 0x698   :  { %4243 = vmatpush3.bf16.msra.mxu1 %v4233_v57  ;;  %4055 = vmatprep.mubr.msk.f32.mxu1 %vm4602_vm1, %v4601_v9 }
 0x699   :  { %4244 = vmatprep.subr.bf16.mxu1 %v4612_v58 }
 0x69c   :  { %4246 = vmatpush3.bf16.msra.mxu1 %v4237_v61 }
 0x69d   :  { %4251 = vmatprep.subr.bf16.mxu1 %v4612_v58 }
 0x69f   :  { %4056 = vmatmul.mubr.msk.f32.vlgmr.msra.gmra.mrb[18].mxu1 %vm53_vm0, %v46_v17 }
 0x6a0   :  { %4058 = vmatprep.mubr.msk.f32.mxu1 %vm4602_vm1, %v4601_v9 }
 0x6a3   :  { %4059 = vmatmul.mubr.msk.f32.gmra.mrb[20].mxu1 %vm53_vm0, %v47_v10 }
 0x6a4   :  { %4061 = vmatprep.mubr.msk.f32.mxu1 %vm4602_vm1, %v4601_v9 }
 0x6a7   :  { %4062 = vmatmul.mubr.msk.f32.gmra.mrb[22].mxu1 %vm53_vm0, %v48_v12 }
 0x6a8   :  { %4075 = vmatprep.mubr.msk.f32.mxu1 %vm4602_vm1, %v4601_v9 }
 0x76a   :  { %v4035_v16 = vpop.f32.mrb[16].mxu1 }
 0x76b   :  { %v1598_v18 = vadd.f32 %v4035_v16, %v1518_v15  ;;  %v1592_v19 = vpop.f32.mrb[17].mxu1 }
 0x76c   :  { %v1593_v20 = vadd.f32 %v1592_v19, %v1518_v15 }
 0x76d   :  { %v1602_v21 = vadd.f32 %v1598_v18, %v4683_v8 }
 0x76e   :  { %v1601_v22 = vadd.f32 %v1593_v20, %v4674_v6 }
 0x76f   :  { %v1606_v23 = vsel %vm53_vm0, %v1602_v21, 0.0 }
 0x770   :  { %1607 = vadd.xlane.f32.xlu1 %v1606_v23  ;;  %v1603_v24 = vsel %vm53_vm0, %v1601_v22, 0.0 }
 0x771   :  { %1604 = vadd.xlane.f32.xlu0 %v1603_v24 }
 0x772   :  { %v1817_v45 = vpop.f32.mrb[18].mxu1 }
 0x773   :  { %v4057_v26 = vpop.f32.mrb[19].mxu1  ;;  %v4987_v16 = vadd.f32 %v4936_v27, %v1817_v45 }
 0x776   :  { %v1822_v29 = vpop.f32.mrb[20].mxu1 }
 0x777   :  { %v4939_v0 = vadd.f32 %v4936_v27, %v1822_v29  ;;  %v4060_v8 = vpop.f32.mrb[21].mxu1 }
 0x779   :  { %v4946_v2 = vmul.f32 %v4939_v0, %v4741_v35  ;;  %v4950_v5 = vmul.f32 %v4939_v0, %v4736_v32  ;;  %v4954_v14 = vmul.f32 %v4822_v48, %v4939_v0  ;;  %v4958_v30 = vmul.f32 %v4824_v50, %v4939_v0 }
 0x77a   :  { %v1827_v1 = vpop.f32.mrb[22].mxu1  ;;  %v4991_v18 = vpack.i.bf16 %v4939_v0, %v4987_v16 }
 0x77b   :  { %v4942_v6 = vadd.f32 %v4936_v27, %v1827_v1  ;;  %v4063_v3 = vpop.f32.mrb[23].mxu1  ;;  %v2831_v37 = vrot.slane %v4946_v2, 4  ;;  %v2747_v38 = vrot.slane %v4950_v5, 4  ;;  %v3009_v40 = vrot.slane %v4954_v14, 4 }
 0x77c   :  { %v3188_v41 = vrot.slane %v4958_v30, 4 }
 0x77d   :  { %v2745_v31 = vmul.f32 %v4942_v6, %v4736_v32  ;;  %v2651_v33 = vmul.f32 %v4942_v6, %v4741_v35  ;;  %v3007_v34 = vmul.f32 %v4822_v48, %v4942_v6  ;;  %v3186_v36 = vmul.f32 %v4824_v50, %v4942_v6 }
 0x77f   :  { %v2748_v28 = vrot.slane %v2745_v31, 4  ;;  %v2832_v39 = vrot.slane %v2651_v33, 4  ;;  %v3010_v42 = vrot.slane %v3007_v34, 4  ;;  %v3189_v43 = vrot.slane %v3186_v36, 4 }
 0x780   :  { %v1646_v36 = vsub.s32 3, %v4689_v11 }
 0x781   :  { %v2749_v44 = vsel %vm2044_vm13, %v2747_v38, %v2748_v28  ;;  %v2833_v46 = vsel %vm2044_vm13, %v2831_v37, %v2832_v39  ;;  %v3011_v51 = vsel %vm2044_vm13, %v3009_v40, %v3010_v42  ;;  %v3190_v52 = vsel %vm2044_vm13, %v3188_v41, %v3189_v43  ;;  %4399 = vrot.lane.b32.xlu1 %v4991_v18, %s4605_s8 }
 0x782   :  { %v4974_v47 = vpack.i.bf16 %v2748_v28, %v2749_v44  ;;  %v4976_v49 = vpack.i.bf16 %v2832_v39, %v2833_v46  ;;  %v4980_v53 = vpack.i.bf16 %v3010_v42, %v3011_v51  ;;  %v4982_v54 = vpack.i.bf16 %v3189_v43, %v3190_v52 }
 0x783   :  { %v1652_v37 = vsub.s32 4, %v4689_v11  ;;  %v5000_v38 = vrot.slane %v4699_v13, %v1646_v36  ;;  %v1937_v36 = vmul.f32 %v4987_v16, %v4741_v35 }
 0x785   :  { %v5003_v39 = vrot.slane %v4699_v13, %v1652_v37 }
 0x7fd   :  { %v1608_v57 = vpop.xlane.xlu1 %1607 }
 0x7fe   :  { %v1611_v61 = vmul.f32 0.03125, %v1608_v57  ;;  %v1605_v62 = vpop.xlane.xlu0 %1604 }
 0x7ff   :  { %v1610_v63 = vmul.f32 0.03125, %v1605_v62 }
 0x800   :  { %v1613_v4 = vsub.f32 %v1602_v21, %v1611_v61 }
 0x801   :  { %v1612_v7 = vsub.f32 %v1601_v22, %v1610_v63  ;;  %v2557_v63 = vrot.slane %v4942_v6, 4 }
 0x802   :  { %v1615_v12 = vmul.f32 %v1613_v4, %v1613_v4 }
 0x803   :  { %v1614_v17 = vmul.f32 %v1612_v7, %v1612_v7 }
 0x804   :  { %v1619_v15 = vsel %vm53_vm0, %v1615_v12, 0.0 }
 0x805   :  { %v1616_v10 = vsel %vm53_vm0, %v1614_v17, 0.0 }
 0x806   :  { %1617 = vadd.xlane.f32.xlu0 %v1616_v10  ;;  %v4400_v10 = vpop.permute.xlu1 %4399 }
 0x807   :  { %v4402_v12 = vunpack.i.h.bf16 %v4400_v10 }
 0x80a   :  { %1620 = vadd.xlane.f32.xlu0 %v1619_v15  ;;  %v4401_v15 = vunpack.i.l.bf16 %v4400_v10 }
 0x820   :  { %4404 = vrot.lane.b32.xlu0 %v4991_v18, %s4603_s6 }
 0x893   :  { %v1618_v19 = vpop.xlane.xlu0 %1617 }
 0x894   :  { %v1622_v20 = vmul.f32 0.032258064, %v1618_v19  ;;  %v4252_v19 = vpack.c.bf16 %v4402_v12, %v4401_v15 }
 0x896   :  { %4520 = vrsqrt.f32 %v1622_v20  ;;  %vm1626_vm14 = vcmp.eq.f32.partialorder %v1622_v20, inf  ;;  %v1629_v25 = vand.u32 2147483648, %v1622_v20  ;;  %vm1628_vm15 = vcmp.eq.f32.partialorder %v1622_v20, 0.0  ;;  %4254 = vmatpush3.bf16.xpose.msk.msra.mxu1 %vm5017_vm5, %v4252_v19 }
 0x897   :  { %v1621_v21 = vpop.xlane.xlu0 %1620  ;;  %4263 = vmatprep.subr.bf16.mxu1 %v4612_v58 }
 0x898   :  { %v1623_v22 = vmul.f32 0.032258064, %v1621_v21 }
 0x89a   :  { %4522 = vrsqrt.f32 %v1623_v22  ;;  %vm1633_vm3 = vcmp.eq.f32.partialorder %v1623_v22, inf  ;;  %v1636_v3 = vand.u32 2147483648, %v1623_v22  ;;  %vm1635_vm4 = vcmp.eq.f32.partialorder %v1623_v22, 0.0 }
 0x89b   :  { %v4405_v41 = vpop.permute.xlu0 %4404 }
 0x89c   :  { %v4407_v44 = vunpack.i.h.bf16 %v4405_v41  ;;  %v4406_v46 = vunpack.i.l.bf16 %v4405_v41  ;;  %v2292_v41 = vmul.f32 %v4822_v48, %v4987_v16 }
 0x89e   :  { %v4248_v61 = vpack.c.bf16 %v4407_v44, %v4406_v46 }
 0x8a0   :  { %v4521_v23 = vpop.eup %4520 }
 0x8a1   :  { %v1625_v24 = vmul.f32 %v4521_v23, %v1622_v20 }
 0x8a3   :  { %v1627_v45 = vsel %vm1626_vm14, %v1622_v20, %v1625_v24 }
 0x8a4   :  { %v4523_v26 = vpop.eup %4522  ;;  %v1630_v29 = vsel %vm1628_vm15, %v1629_v25, %v1627_v45 }
 0x8a5   :  { %v1638_v8 = vadd.f32 1e-12, %v1630_v29  ;;  %v1632_v1 = vmul.f32 %v4523_v26, %v1623_v22 }
 0x8a7   :  { %4524 = vrcp.f32 %v1638_v8  ;;  %v1634_v31 = vsel %vm1633_vm3, %v1623_v22, %v1632_v1 }
 0x8a8   :  { %v1637_v33 = vsel %vm1635_vm4, %v1636_v3, %v1634_v31 }
 0x8a9   :  { %v1639_v34 = vadd.f32 1e-12, %v1637_v33 }
 0x8ab   :  { %4526 = vrcp.f32 %v1639_v34 }
 0x8b1   :  { %v4525_v28 = vpop.eup %4524 }
 0x8b2   :  { %v1642_v40 = vmul.f32 %v4525_v28, %v1612_v7 }
 0x8b4   :  { %v1648_v42 = vmul.f32 %v5000_v38, %v1642_v40  ;;  %v4418_v40 = vpack.i.bf16 %v4946_v2, %v1937_v36 }
 0x8b5   :  { %v4527_v43 = vpop.eup %4526 }
 0x8b6   :  { %v5007_v51 = vadd.f32 %v5003_v39, %v1648_v42  ;;  %v1643_v52 = vmul.f32 %v4527_v43, %v1613_v4  ;;  %v2556_v4 = vrot.slane %v4939_v0, 4  ;;  %v4423_v42 = vpack.i.bf16 %v4954_v14, %v2292_v41 }
 0x8b7   :  { %v2032_v43 = vmul.f32 %v4987_v16, %v4736_v32 }
 0x8b8   :  { %4044 = vmatprep.mubr.msk.f32.mxu0 %vm53_vm0, %v5007_v51  ;;  %v1649_v57 = vmul.f32 %v5000_v38, %v1643_v52  ;;  %v2558_v7 = vsel %vm2044_vm13, %v2556_v4, %v2557_v63 }
 0x8b9   :  { %v5031_v17 = vpack.i.bf16 %v2557_v63, %v2558_v7  ;;  %v4413_v35 = vpack.i.bf16 %v4950_v5, %v2032_v43 }
 0x8ba   :  { %v5013_v13 = vadd.f32 %v5003_v39, %v1649_v57 }
 0x8bc   :  { %4045 = vmatmul.mubr.msk.f32.vlgmr.msra.gmra.mrb[6].mxu0 %vm53_vm0, %v5013_v13 }
 0x8bd   :  { %4250 = vmatpush3.bf16.xpose.msk.msra.mxu0 %vm5017_vm5, %v4248_v61  ;;  %4068 = vmatprep.mubr.msk.f32.mxu0 %vm4602_vm1, %v4601_v9 }
 0x8be   :  { %4255 = vmatprep.subr.bf16.mxu0 %v4612_v58 }
 0x98f   :  { %v4046_v20 = vpop.f32.mrb[6].mxu0 }
 0x990   :  { %v1733_v21 = vpop.f32.mrb[7].mxu0  ;;  %v1836_v14 = vadd.f32 %v4046_v20, %v4936_v27 }
 0x991   :  { %v1835_v22 = vadd.f32 %v4936_v27, %v1733_v21 }
 0x992   :  { %v5082_v32 = vmul.f32 0.35355338, %v1836_v14 }
 0x993   :  { %v5037_v6 = vmul.f32 0.35355338, %v1835_v22 }
 0x995   :  { %2199 = vrot.lane.b32.xlu0 %v5037_v6, %s4607_s10  ;;  %1939 = vrot.lane.b32.xlu1 %v5037_v6, %s4604_s7 }
 0x996   :  { %4069 = vmatmul.mubr.msk.f32.vlgmr.msra.gmra.mrb[8].mxu0 %vm146_vm2, %v5037_v6 }
 0x997   :  { %4082 = vmatprep.mubr.msk.f32.mxu0 %vm4602_vm1, %v4601_v9 }
 0x999   :  { %4409 = vrot.lane.b32.xlu1 %v4991_v18, %s4609_s12 }
 0xa07   :  { %v1940_v0 = vpop.permute.xlu1 %1939  ;;  %v2200_v26 = vpop.permute.xlu0 %2199 }
 0xa08   :  { %4076 = vmatmul.mubr.msk.f32.vlgmr.msra.gmra.mrb[24].mxu1 %vm146_vm2, %v1940_v0 }
 0xa09   :  { %4096 = vmatprep.mubr.msk.f32.mxu1 %vm4602_vm1, %v4601_v9 }
 0xa0b   :  { %v4410_v23 = vpop.permute.xlu1 %4409 }
 0xa0c   :  { %v4412_v24 = vunpack.i.h.bf16 %v4410_v23  ;;  %v4411_v25 = vunpack.i.l.bf16 %v4410_v23 }
 0xa0e   :  { %v4264_v45 = vpack.c.bf16 %v4412_v24, %v4411_v25 }
 0xa10   :  { %4266 = vmatpush3.bf16.xpose.msk.msra.mxu1 %vm5017_vm5, %v4264_v45 }
 0xa11   :  { %4279 = vmatprep.subr.bf16.mxu1 %v4612_v58 }
 0xa17   :  { %4097 = vmatmul.mubr.msk.f32.vlgmr.msra.gmra.mrb[26].mxu1 %vm146_vm2, %v2200_v26 }
 0xa18   :  { %4124 = vmatprep.mubr.msk.f32.mxu1 %vm4602_vm1, %v4601_v9 }
 0xa69   :  { %v1921_v29 = vpop.f32.mrb[8].mxu0 }
 0xa6a   :  { %v4070_v8 = vpop.f32.mrb[9].mxu0  ;;  %v1926_v1 = vsel %vm1925_vm6, %v1921_v29, -inf }
 0xa6b   :  { %1927 = vmax.xlane.f32.xlu0 %v1926_v1 }
 0xadb   :  { %v2017_v3 = vpop.f32.mrb[24].mxu1 }
 0xadc   :  { %v4077_v31 = vpop.f32.mrb[25].mxu1  ;;  %v2021_v33 = vsel %vm1925_vm6, %v2017_v3, -inf }
 0xadd   :  { %2022 = vmax.xlane.f32.xlu1 %v2021_v33 }
 0xaea   :  { %v2277_v34 = vpop.f32.mrb[26].mxu1 }
 0xaeb   :  { %v4098_v37 = vpop.f32.mrb[27].mxu1  ;;  %v2281_v28 = vsel %vm1925_vm6, %v2277_v34, -inf }
 0xaec   :  { %2282 = vmax.xlane.f32.xlu0 %v2281_v28 }
 0xaee   :  { %4419 = vrot.lane.b32.xlu1 %v4418_v40, %s4606_s9 }
 0xaf2   :  { %4424 = vrot.lane.b32.xlu1 %v4423_v42, %s4606_s9 }
 0xaf8   :  { %v1928_v44 = vpop.xlane.xlu0 %1927 }
 0xaf9   :  { %v1929_v46 = vsub.f32 %v1921_v29, %v1928_v44 }
 0xafb   :  { %v1930_v52 = vmul.f32 1.442695, %v1929_v46 }
 0xafd   :  { %4528 = vpow2.f32 %v1930_v52 }
 0xb02   :  { %4414 = vrot.lane.b32.xlu0 %v4413_v35, %s4606_s9 }
 0xb07   :  { %v5073_v2 = vpop.eup %4528 }
 0xb08   :  { %v1932_v48 = vsel %vm1925_vm6, %v5073_v2, 0.0 }
 0xb21   :  { %1933 = vadd.xlane.f32.xlu0 %v1932_v48 }
 0xb37   :  { %4429 = vrot.lane.b32.xlu0 %v5031_v17, %s4603_s6 }
 0xb3b   :  { %4439 = vrot.lane.b32.xlu0 %v5031_v17, %s4605_s8 }
 0xb3f   :  { %2652 = vrot.lane.b32.xlu0 %v5082_v32, %s4604_s7 }
 0xb43   :  { %2914 = vrot.lane.b32.xlu0 %v5082_v32, %s4607_s10 }
 0xb6a   :  { %v2023_v5 = vpop.xlane.xlu1 %2022 }
 0xb6b   :  { %v2024_v57 = vsub.f32 %v2017_v3, %v2023_v5 }
 0xb6d   :  { %v2025_v61 = vmul.f32 1.442695, %v2024_v57 }
 0xb6e   :  { %v4420_v33 = vpop.permute.xlu1 %4419 }
 0xb6f   :  { %4530 = vpow2.f32 %v2025_v61  ;;  %v4422_v37 = vunpack.i.h.bf16 %v4420_v33  ;;  %v4421_v28 = vunpack.i.l.bf16 %v4420_v33 }
 0xb71   :  { %v4260_v42 = vpack.c.bf16 %v4422_v37, %v4421_v28 }
 0xb79   :  { %v4531_v63 = vpop.eup %4530  ;;  %v2283_v4 = vpop.xlane.xlu0 %2282 }
 0xb7a   :  { %v2027_v7 = vsel %vm1925_vm6, %v4531_v63, 0.0  ;;  %v2284_v21 = vsub.f32 %v2277_v34, %v2283_v4  ;;  %v4425_v34 = vpop.permute.xlu1 %4424 }
 0xb7b   :  { %2028 = vadd.xlane.f32.xlu1 %v2027_v7  ;;  %v4427_v43 = vunpack.i.h.bf16 %v4425_v34  ;;  %v4426_v35 = vunpack.i.l.bf16 %v4425_v34 }
 0xb7c   :  { %v2285_v22 = vmul.f32 1.442695, %v2284_v21 }
 0xb7d   :  { %v4415_v10 = vpop.permute.xlu0 %4414  ;;  %v4268_v46 = vpack.c.bf16 %v4427_v43, %v4426_v35 }
 0xb7e   :  { %v4417_v12 = vunpack.i.h.bf16 %v4415_v10  ;;  %v4416_v15 = vunpack.i.l.bf16 %v4415_v10  ;;  %4532 = vpow2.f32 %v2285_v22 }
 0xb80   :  { %v4256_v20 = vpack.c.bf16 %v4417_v12, %v4416_v15 }
 0xb82   :  { %4258 = vmatpush3.bf16.msk.msra.mxu0 %vm5090_vm8, %v4256_v20 }
 0xb83   :  { %4259 = vmatprep.subr.bf16.mxu0 %v4612_v58 }
 0xb88   :  { %v4533_v0 = vpop.eup %4532 }
 0xb89   :  { %v2287_v24 = vsel %vm1925_vm6, %v4533_v0, 0.0 }
 0xb8c   :  { %4434 = vrot.lane.b32.xlu1 %v4991_v18, %s4610_s13 }
 0xbae   :  { %v1934_v23 = vpop.xlane.xlu0 %1933 }
 0xbb0   :  { %2288 = vadd.xlane.f32.xlu1 %v2287_v24 }
 0xbb2   :  { %v4430_v25 = vpop.permute.xlu0 %4429 }
 0xbb3   :  { %v4432_v45 = vunpack.i.h.bf16 %v4430_v25  ;;  %v4431_v26 = vunpack.i.l.bf16 %v4430_v25 }
 0xbb5   :  { %v4280_v29 = vpack.c.bf16 %v4432_v45, %v4431_v26 }
 0xbb6   :  { %v4440_v8 = vpop.permute.xlu0 %4439 }
 0xbb7   :  { %4282 = vmatpush3.bf16.xpose.msk.msra.mxu1 %vm5017_vm5, %v4280_v29  ;;  %v4442_v1 = vunpack.i.h.bf16 %v4440_v8  ;;  %v4441_v18 = vunpack.i.l.bf16 %v4440_v8 }
 0xbb8   :  { %4283 = vmatprep.subr.bf16.mxu1 %v4612_v58 }
 0xbb9   :  { %v4284_v3 = vpack.c.bf16 %v4442_v1, %v4441_v18 }
 0xbba   :  { %v2653_v31 = vpop.permute.xlu0 %2652 }
 0xbbe   :  { %4125 = vmatmul.mubr.msk.f32.vlgmr.msra.gmra.mrb[28].mxu1 %vm146_vm2, %v5082_v32  ;;  %v2915_v15 = vpop.permute.xlu0 %2914 }
 0xbbf   :  { %4286 = vmatpush3.bf16.xpose.msk.msra.mxu1 %vm5017_vm5, %v4284_v3  ;;  %4131 = vmatprep.mubr.msk.f32.mxu1 %vm4602_vm1, %v4601_v9 }
 0xbc0   :  { %4295 = vmatprep.subr.bf16.mxu1 %v4612_v58 }
 0xbc1   :  { %2377 = vrot.lane.b32.xlu1 %v5037_v6, %s4608_s11 }
 0xbc5   :  { %4444 = vrot.lane.b32.xlu1 %v5031_v17, %s4609_s12 }
 0xbc6   :  { %4132 = vmatmul.mubr.msk.f32.vlgmr.msra.gmra.mrb[30].mxu1 %vm146_vm2, %v2653_v31 }
 0xbc7   :  { %4152 = vmatprep.mubr.msk.f32.mxu1 %vm4602_vm1, %v4601_v9 }
 0xc08   :  { %v2029_v36 = vpop.xlane.xlu1 %2028 }
 0xc09   :  { %4534 = vrcp.f32 %v2029_v36 }
 0xc0a   :  { %4536 = vrcp.f32 %v1934_v23 }
 0xc0c   :  { %v4435_v52 = vpop.permute.xlu1 %4434 }
 0xc0d   :  { %v4437_v57 = vunpack.i.h.bf16 %v4435_v52  ;;  %v4436_v61 = vunpack.i.l.bf16 %v4435_v52 }
 0xc0f   :  { %v4272_v12 = vpack.c.bf16 %v4437_v57, %v4436_v61  ;;  %v2470_v57 = vmul.f32 %v4824_v50, %v4987_v16 }
 0xc11   :  { %v4448_v61 = vpack.i.bf16 %v4958_v30, %v2470_v57 }
 0xc13   :  { %v4535_v40 = vpop.eup %4534 }
 0xc14   :  { %v2031_v41 = vmul.f32 %v4535_v40, %v4531_v63  ;;  %v4537_v6 = vpop.eup %4536 }
 0xc15   :  { %v1936_v44 = vmul.f32 %v4537_v6, %v5073_v2 }
 0xc16   :  { %4083 = vmatmul.mubr.msk.f32.vlgmr.msra.gmra.mrb[10].mxu0 %vm1925_vm6, %v2031_v41 }
 0xc17   :  { %4262 = vmatpush3.bf16.msk.msra.mxu0 %vm5090_vm8, %v4260_v42  ;;  %4089 = vmatprep.mubr.msk.f32.mxu0 %vm4602_vm1, %v4601_v9 }
 0xc18   :  { %4267 = vmatprep.subr.bf16.mxu0 %v4612_v58 }
 0xc1e   :  { %4090 = vmatmul.mubr.msk.f32.vlgmr.msra.gmra.mrb[10].mxu0 %vm1925_vm6, %v1936_v44 }
 0xc1f   :  { %4270 = vmatpush3.bf16.msk.msra.mxu0 %vm5090_vm8, %v4268_v46  ;;  %4103 = vmatprep.mubr.msk.f32.mxu0 %vm4602_vm1, %v4601_v9 }
 0xc20   :  { %4271 = vmatprep.subr.bf16.mxu0 %v4612_v58 }
 0xc3d   :  { %v2289_v48 = vpop.xlane.xlu1 %2288 }
 0xc3e   :  { %4538 = vrcp.f32 %v2289_v48 }
 0xc41   :  { %v2378_v14 = vpop.permute.xlu1 %2377 }
 0xc45   :  { %v4445_v5 = vpop.permute.xlu1 %4444 }
 0xc46   :  { %v4447_v63 = vunpack.i.h.bf16 %v4445_v5  ;;  %v4446_v2 = vunpack.i.l.bf16 %v4445_v5 }
 0xc48   :  { %v4539_v4 = vpop.eup %4538  ;;  %v4296_v7 = vpack.c.bf16 %v4447_v63, %v4446_v2 }
 0xc49   :  { %v2291_v10 = vmul.f32 %v4539_v4, %v4533_v0 }
 0xc4a   :  { %4298 = vmatpush3.bf16.xpose.msk.msra.mxu1 %vm5017_vm5, %v4296_v7 }
 0xc4b   :  { %4104 = vmatmul.mubr.msk.f32.vlgmr.msra.gmra.mrb[10].mxu0 %vm1925_vm6, %v2291_v10 }
 0xc4c   :  { %4274 = vmatpush3.bf16.xpose.msk.msra.mxu0 %vm5017_vm5, %v4272_v12  ;;  %4110 = vmatprep.mubr.msk.f32.mxu0 %vm4602_vm1, %v4601_v9 }
 0xc4d   :  { %4275 = vmatprep.subr.bf16.mxu0 %v4612_v58 }
 0xc51   :  { %4153 = vmatmul.mubr.msk.f32.vlgmr.msra.gmra.mrb[32].mxu1 %vm146_vm2, %v2915_v15 }
 0xc53   :  { %4111 = vmatmul.mubr.msk.f32.vlgmr.msra.gmra.mrb[12].mxu0 %vm146_vm2, %v2378_v14 }
 0xc54   :  { %4117 = vmatprep.mubr.msk.f32.mxu0 %vm4602_vm1, %v4601_v9 }
 0xc91   :  { %v2636_v20 = vpop.f32.mrb[28].mxu1 }
 0xc92   :  { %v4126_v21 = vpop.f32.mrb[29].mxu1  ;;  %v2640_v24 = vsel %vm1925_vm6, %v2636_v20, -inf }
 0xc99   :  { %v2730_v22 = vpop.f32.mrb[30].mxu1 }
 0xc9a   :  { %v4133_v0 = vpop.f32.mrb[31].mxu1  ;;  %v2734_v23 = vsel %vm1925_vm6, %v2730_v22, -inf }
 0xc9b   :  { %2735 = vmax.xlane.f32.xlu0 %v2734_v23 }
 0xc9f   :  { %2641 = vmax.xlane.f32.xlu0 %v2640_v24 }
 0xd24   :  { %v2992_v25 = vpop.f32.mrb[32].mxu1 }
 0xd25   :  { %v4154_v45 = vpop.f32.mrb[33].mxu1  ;;  %v2996_v31 = vsel %vm1925_vm6, %v2992_v25, -inf }
 0xd26   :  { %v2455_v26 = vpop.f32.mrb[12].mxu0 }
 0xd27   :  { %v4112_v29 = vpop.f32.mrb[13].mxu0  ;;  %v2459_v8 = vsel %vm1925_vm6, %v2455_v26, -inf }
 0xd28   :  { %2460 = vmax.xlane.f32.xlu1 %v2459_v8  ;;  %v2736_v1 = vpop.xlane.xlu0 %2735 }
 0xd29   :  { %v2737_v18 = vsub.f32 %v2730_v22, %v2736_v1 }
 0xd2b   :  { %v2738_v3 = vmul.f32 1.442695, %v2737_v18 }
 0xd2c   :  { %2997 = vmax.xlane.f32.xlu1 %v2996_v31  ;;  %v2642_v33 = vpop.xlane.xlu0 %2641 }
 0xd2d   :  { %4540 = vpow2.f32 %v2738_v3  ;;  %v2643_v34 = vsub.f32 %v2636_v20, %v2642_v33 }
 0xd2f   :  { %v2644_v36 = vmul.f32 1.442695, %v2643_v34 }
 0xd31   :  { %4542 = vpow2.f32 %v2644_v36 }
 0xd37   :  { %v4541_v37 = vpop.eup %4540 }
 0xd38   :  { %v2740_v28 = vsel %vm1925_vm6, %v4541_v37, 0.0 }
 0xd39   :  { %2741 = vadd.xlane.f32.xlu1 %v2740_v28 }
 0xd3b   :  { %v5147_v40 = vpop.eup %4542 }
 0xd3c   :  { %v2646_v41 = vsel %vm1925_vm6, %v5147_v40, 0.0 }
 0xd3d   :  { %2647 = vadd.xlane.f32.xlu0 %v2646_v41 }
 0xdb5   :  { %v2461_v42 = vpop.xlane.xlu1 %2460 }
 0xdb6   :  { %v2462_v6 = vsub.f32 %v2455_v26, %v2461_v42 }
 0xdb8   :  { %v2463_v43 = vmul.f32 1.442695, %v2462_v6 }
 0xdb9   :  { %v2998_v35 = vpop.xlane.xlu1 %2997 }
 0xdba   :  { %4544 = vpow2.f32 %v2463_v43  ;;  %v2999_v44 = vsub.f32 %v2992_v25, %v2998_v35 }
 0xdbc   :  { %v3000_v46 = vmul.f32 1.442695, %v2999_v44  ;;  %v4483_v44 = vpack.i.bf16 %v4901_v60, %v4896_v59 }
 0xdbe   :  { %4546 = vpow2.f32 %v3000_v46 }
 0xdc4   :  { %v4545_v52 = vpop.eup %4544 }
 0xdc5   :  { %v2465_v48 = vsel %vm1925_vm6, %v4545_v52, 0.0 }
 0xdc6   :  { %2466 = vadd.xlane.f32.xlu0 %v2465_v48  ;;  %v2742_v16 = vpop.xlane.xlu1 %2741 }
 0xdc8   :  { %v4547_v14 = vpop.eup %4546 }
 0xdc9   :  { %v3002_v5 = vsel %vm1925_vm6, %v4547_v14, 0.0 }
 0xdca   :  { %3003 = vadd.xlane.f32.xlu1 %v3002_v5  ;;  %v2648_v50 = vpop.xlane.xlu0 %2647 }
 0xddb   :  { %4454 = vrot.lane.b32.xlu1 %v4974_v47, %s4606_s9 }
 0xddc   :  { %4449 = vrot.lane.b32.xlu0 %v4448_v61, %s4606_s9 }
 0xddf   :  { %4459 = vrot.lane.b32.xlu1 %v4976_v49, %s4606_s9 }
 0xde0   :  { %4464 = vrot.lane.b32.xlu0 %v4980_v53, %s4606_s9 }
 0xde3   :  { %4469 = vrot.lane.b32.xlu1 %v5031_v17, %s4610_s13 }
 0xde4   :  { %3093 = vrot.lane.b32.xlu0 %v5082_v32, %s4608_s11 }
 0xe53   :  { %v2467_v30 = vpop.xlane.xlu0 %2466 }
 0xe54   :  { %4548 = vrcp.f32 %v2467_v30 }
 0xe55   :  { %4550 = vrcp.f32 %v2742_v16 }
 0xe56   :  { %4552 = vrcp.f32 %v2648_v50 }
 0xe57   :  { %v4450_v47 = vpop.permute.xlu0 %4449  ;;  %v3004_v63 = vpop.xlane.xlu1 %3003 }
 0xe58   :  { %v4452_v2 = vunpack.i.h.bf16 %v4450_v47  ;;  %v4451_v4 = vunpack.i.l.bf16 %v4450_v47  ;;  %4554 = vrcp.f32 %v3004_v63 }
 0xe5a   :  { %v4276_v7 = vpack.c.bf16 %v4452_v2, %v4451_v4 }
 0xe5b   :  { %v4455_v49 = vpop.permute.xlu1 %4454  ;;  %v4465_v24 = vpop.permute.xlu0 %4464 }
 0xe5c   :  { %v4457_v10 = vunpack.i.h.bf16 %v4455_v49  ;;  %v4456_v12 = vunpack.i.l.bf16 %v4455_v49  ;;  %4278 = vmatpush3.bf16.msk.msra.mxu0 %vm5090_vm8, %v4276_v7  ;;  %v4467_v45 = vunpack.i.h.bf16 %v4465_v24  ;;  %v4466_v26 = vunpack.i.l.bf16 %v4465_v24 }
 0xe5d   :  { %4287 = vmatprep.subr.bf16.mxu0 %v4612_v58 }
 0xe5e   :  { %v4549_v53 = vpop.eup %4548  ;;  %v4288_v17 = vpack.c.bf16 %v4457_v10, %v4456_v12  ;;  %v4300_v8 = vpack.c.bf16 %v4467_v45, %v4466_v26 }
 0xe5f   :  { %v2469_v32 = vmul.f32 %v4549_v53, %v4545_v52  ;;  %v4460_v15 = vpop.permute.xlu1 %4459  ;;  %v4551_v20 = vpop.eup %4550 }
 0xe60   :  { %v4462_v21 = vunpack.i.h.bf16 %v4460_v15  ;;  %v4461_v22 = vunpack.i.l.bf16 %v4460_v15  ;;  %v2744_v23 = vmul.f32 %v4551_v20, %v4541_v37  ;;  %v4553_v25 = vpop.eup %4552  ;;  %v3094_v36 = vpop.permute.xlu0 %3093 }
 0xe61   :  { %4118 = vmatmul.mubr.msk.f32.vlgmr.msra.gmra.mrb[10].mxu0 %vm1925_vm6, %v2469_v32  ;;  %v2650_v29 = vmul.f32 %v4553_v25, %v5147_v40 }
 0xe62   :  { %v4292_v0 = vpack.c.bf16 %v4462_v21, %v4461_v22  ;;  %4290 = vmatpush3.bf16.msk.msra.mxu0 %vm5090_vm8, %v4288_v17  ;;  %4138 = vmatprep.mubr.msk.f32.mxu0 %vm4602_vm1, %v4601_v9  ;;  %v4555_v18 = vpop.eup %4554 }
 0xe63   :  { %4291 = vmatprep.subr.bf16.mxu0 %v4612_v58  ;;  %v4470_v1 = vpop.permute.xlu1 %4469  ;;  %v3006_v33 = vmul.f32 %v4555_v18, %v4547_v14 }
 0xe64   :  { %v4472_v3 = vunpack.i.h.bf16 %v4470_v1  ;;  %v4471_v31 = vunpack.i.l.bf16 %v4470_v1 }
 0xe65   :  { %4139 = vmatmul.mubr.msk.f32.vlgmr.msra.gmra.mrb[14].mxu0 %vm1925_vm6, %v2744_v23 }
 0xe66   :  { %4294 = vmatpush3.bf16.msk.msra.mxu0 %vm5090_vm8, %v4292_v0  ;;  %4145 = vmatprep.mubr.msk.f32.mxu0 %vm4602_vm1, %v4601_v9  ;;  %v4304_v34 = vpack.c.bf16 %v4472_v3, %v4471_v31 }
 0xe67   :  { %4299 = vmatprep.subr.bf16.mxu0 %v4612_v58 }
 0xe6d   :  { %4146 = vmatmul.mubr.msk.f32.vlgmr.msra.gmra.mrb[14].mxu0 %vm1925_vm6, %v2650_v29 }
 0xe6e   :  { %4302 = vmatpush3.bf16.msk.msra.mxu0 %vm5090_vm8, %v4300_v8  ;;  %4159 = vmatprep.mubr.msk.f32.mxu0 %vm4602_vm1, %v4601_v9 }
 0xe6f   :  { %4303 = vmatprep.subr.bf16.mxu0 %v4612_v58 }
 0xe75   :  { %4160 = vmatmul.mubr.msk.f32.vlgmr.msra.gmra.mrb[14].mxu0 %vm1925_vm6, %v3006_v33 }
 0xe76   :  { %4166 = vmatprep.mubr.msk.f32.mxu0 %vm4602_vm1, %v4601_v9 }
 0xe77   :  { %4306 = vmatpush3.bf16.xpose.msk.msra.mxu0 %vm5017_vm5, %v4304_v34 }
 0xe78   :  { %4307 = vmatprep.subr.bf16.mxu0 %v4612_v58 }
 0xe7e   :  { %4167 = vmatmul.mubr.msk.f32.vlgmr.msra.gmra.mrb[16].mxu0 %vm146_vm2, %v3094_v36 }
 0xe7f   :  { %4173 = vmatprep.mubr.msk.f32.mxu0 %vm4602_vm1, %v4601_v9  ;;  %v4478_v9 = vpack.i.bf16 %v4888_v56, %v4883_v55 }
 0xf34   :  { %v2550_v37 = vpop.f32.mrb[10].mxu0 }
 0xf35   :  { %v4119_v28 = vpop.f32.mrb[11].mxu0  ;;  %4184 = vmatprep.mubr.msk.f32.mxu1 %vm53_vm0, %v2550_v37 }
 0xf51   :  { %v3171_v40 = vpop.f32.mrb[16].mxu0 }
 0xf52   :  { %v4168_v41 = vpop.f32.mrb[17].mxu0  ;;  %v3175_v42 = vsel %vm1925_vm6, %v3171_v40, -inf }
 0xf53   :  { %3176 = vmax.xlane.f32.xlu1 %v3175_v42  ;;  %v3427_v41 = vld [vmem:[%s5307_s3] sm:$0xff]  ;;  %v3428_v42 = vld [vmem:[%s5307_s3 + $0x8] sm:$0xff] }
 0xf64   :  { %4479 = vrot.lane.b32.xlu1 %v4478_v9, %s4611_s14 }
 0xf68   :  { %4484 = vrot.lane.b32.xlu1 %v4483_v44, %s4611_s14 }
 0xfe0   :  { %v3177_v6 = vpop.xlane.xlu1 %3176 }
 0xfe1   :  { %v3178_v62 = vsub.f32 %v3171_v40, %v3177_v6  ;;  %v3429_v6 = vld [vmem:[%s5307_s3 + $0x10] sm:$0xff] }
 0xfe3   :  { %v3179_v43 = vmul.f32 1.442695, %v3178_v62  ;;  %v4319_v62 = vpack.c.bf16 %v3428_v42, %v3427_v41 }
 0xfe4   :  { %v4480_v52 = vpop.permute.xlu1 %4479 }
 0xfe5   :  { %4556 = vpow2.f32 %v3179_v43  ;;  %v4482_v48 = vunpack.i.h.bf16 %v4480_v52  ;;  %v4481_v14 = vunpack.i.l.bf16 %v4480_v52  ;;  %v3430_v43 = vld [vmem:[%s5307_s3 + $0x18] sm:$0xff]  ;;  %v3431_v52 = vld [vmem:[%s5307_s3 + $0x20] sm:$0xff] }
 0xfe7   :  { %v4311_v61 = vpack.c.bf16 %v4482_v48, %v4481_v14  ;;  %v3432_v48 = vld [vmem:[%s5307_s3 + $0x28] sm:$0xff]  ;;  %v3433_v14 = vld [vmem:[%s5307_s3 + $0x30] sm:$0xff] }
 0xfe9   :  { %4312 = vmatprep.subr.bf16.mxu1 %v4311_v61 }
 0xfea   :  { %4314 = vmatpush3.bf16.msra.mxu1 %v4311_v61  ;;  %v3435_v61 = vld [vmem:[%s5307_s3 + $0x40] sm:$0xff] }
 0xfef   :  { %v4557_v58 = vpop.eup %4556 }
 0xff0   :  { %v3181_v35 = vsel %vm1925_vm6, %v4557_v58, 0.0 }
 0xff1   :  { %3182 = vadd.xlane.f32.xlu0 %v3181_v35 }
0x1007   :  { %4474 = vrot.lane.b32.xlu0 %v4982_v54, %s4606_s9 }
0x100b   :  { %3289 = vrot.lane.b32.xlu0 %v4936_v27, %s4611_s14  ;;  %v4485_v27 = vpop.permute.xlu1 %4484 }
0x100c   :  { %v4487_v16 = vunpack.i.h.bf16 %v4485_v27  ;;  %v4486_v55 = vunpack.i.l.bf16 %v4485_v27  ;;  %v3436_v27 = vld [vmem:[%s5307_s3 + $0x48] sm:$0xff] }
0x100e   :  { %v4315_v56 = vpack.c.bf16 %v4487_v16, %v4486_v55 }
0x1010   :  { %4316 = vmatprep.subr.bf16.mxu1 %v4315_v56 }
0x1011   :  { %4318 = vmatpush3.bf16.msra.mxu1 %v4315_v56 }
0x1012   :  { %4320 = vmatprep.subr.bf16.mxu1 %v4319_v62 }
0x107e   :  { %v3183_v46 = vpop.xlane.xlu0 %3182 }
0x107f   :  { %4558 = vrcp.f32 %v3183_v46 }
0x1082   :  { %v4475_v5 = vpop.permute.xlu0 %4474 }
0x1083   :  { %v4477_v54 = vunpack.i.h.bf16 %v4475_v5  ;;  %v4476_v57 = vunpack.i.l.bf16 %v4475_v5  ;;  %v4327_v5 = vpack.c.bf16 %v3432_v48, %v3431_v52 }
0x1085   :  { %v4308_v50 = vpack.c.bf16 %v4477_v54, %v4476_v57  ;;  %v3434_v54 = vld [vmem:[%s5307_s3 + $0x38] sm:$0xff] }
0x1086   :  { %v3290_v63 = vpop.permute.xlu0 %3289  ;;  %v4331_v57 = vpack.c.bf16 %v3434_v54, %v3433_v14 }
0x1087   :  { %4310 = vmatpush3.bf16.msk.msra.mxu0 %vm5090_vm8, %v4308_v50  ;;  %v4335_v50 = vpack.c.bf16 %v3436_v27, %v3435_v61 }
0x1088   :  { %4328 = vmatprep.subr.bf16.mxu0 %v4327_v5 }
0x1089   :  { %v4559_v59 = vpop.eup %4558 }
0x108a   :  { %v3185_v60 = vmul.f32 %v4559_v59, %v4557_v58  ;;  %v4323_v58 = vpack.c.bf16 %v3430_v43, %v3429_v6 }
0x108c   :  { %4174 = vmatmul.mubr.msk.f32.vlgmr.msra.gmra.mrb[14].mxu0 %vm1925_vm6, %v3185_v60 }
0x108d   :  { %4330 = vmatpush3.bf16.msra.mxu0 %v4327_v5 }
0x108e   :  { %4332 = vmatprep.subr.bf16.mxu0 %v4331_v57 }
0x1091   :  { %4334 = vmatpush3.bf16.msra.mxu0 %v4331_v57 }
0x1092   :  { %4336 = vmatprep.subr.bf16.mxu0 %v4335_v50 }
0x1095   :  { %4338 = vmatpush3.bf16.msra.mxu0 %v4335_v50 }
0x115f   :  { %v3267_v30 = vpop.f32.mrb[14].mxu0 }
0x1160   :  { %v4175_v47 = vpop.f32.mrb[15].mxu0  ;;  %4185 = vmatmul.mubr.msk.f32.vlgmr.msra.gmra.mrb[34].mxu1 %vm53_vm0, %v3267_v30 }
0x1161   :  { %4322 = vmatpush3.bf16.msra.mxu1 %v4319_v62  ;;  %v3441_v47 = vsub.s32 2, %v4689_v11  ;;  %v3437_v11 = vld [vmem:[%s5307_s3 + $0x50] sm:$0xff] }
0x1162   :  { %4324 = vmatprep.subr.bf16.mxu1 %v4323_v58 }
0x1165   :  { %4326 = vmatpush3.bf16.msra.mxu1 %v4323_v58 }
0x1233   :  { %v4186_v2 = vpop.f32.mrb[34].mxu1 }
0x1234   :  { %v3370_v4 = vadd.f32 %v4186_v2, %v3290_v63  ;;  %v3364_v7 = vpop.f32.mrb[35].mxu1 }
0x1235   :  { %v3365_v49 = vadd.f32 %v3364_v7, %v3290_v63  ;;  %v4576_v63 = vld [vmem:[%s5308_s4] sm:$0xff] }
0x1236   :  { %v3374_v10 = vadd.f32 %v3370_v4, %v5013_v13  ;;  %v3442_v2 = vrot.slane %v4576_v63, %v3441_v47 }
0x1237   :  { %v3373_v19 = vadd.f32 %v3365_v49, %v5007_v51  ;;  %v3438_v49 = vld [vmem:[%s5307_s3 + $0x58] sm:$0xff]  ;;  %s4614_s3 = smov [#allocation2]  }
0x1238   :  { %v3378_v12 = vsel %vm53_vm0, %v3374_v10, 0.0  ;;  %s3709_s4 = sshll.u32 %s4614_s3, 4  ;;  %s3710_s4 = int_to_ptr.vmem [resolvable:$true] %s3709_s4 }
0x1239   :  { %3379 = vadd.xlane.f32.xlu0 %v3378_v12  ;;  %v3375_v53 = vsel %vm53_vm0, %v3373_v19, 0.0  ;;  %p4582_p1 = scmp.lt.s32.totalorder %s3710_s4, %s3710_s4 }
0x123a   :  { %3376 = vadd.xlane.f32.xlu1 %v3375_v53 }
0x12c6   :  { %v3380_v17 = vpop.xlane.xlu0 %3379 }
0x12c7   :  { %v3382_v32 = vmul.f32 0.03125, %v3380_v17  ;;  %v3377_v15 = vpop.xlane.xlu1 %3376 }
0x12c8   :  { %v3381_v20 = vmul.f32 0.03125, %v3377_v15 }
0x12c9   :  { %v3384_v21 = vsub.f32 %v3374_v10, %v3382_v32  ;;  %v4339_v10 = vpack.c.bf16 %v3438_v49, %v3437_v11 }
0x12ca   :  { %v3383_v22 = vsub.f32 %v3373_v19, %v3381_v20 }
0x12cb   :  { %v3386_v0 = vmul.f32 %v3384_v21, %v3384_v21  ;;  %4340 = vmatprep.subr.bf16.mxu0 %v4339_v10 }
0x12cc   :  { %v3385_v23 = vmul.f32 %v3383_v22, %v3383_v22  ;;  %4342 = vmatpush3.bf16.msra.mxu0 %v4339_v10 }
0x12cd   :  { %v3390_v24 = vsel %vm53_vm0, %v3386_v0, 0.0 }
0x12ce   :  { %3391 = vadd.xlane.f32.xlu1 %v3390_v24  ;;  %v3387_v13 = vsel %vm53_vm0, %v3385_v23, 0.0 }
0x12cf   :  { %3388 = vadd.xlane.f32.xlu0 %v3387_v13 }
0x135b   :  { %v3392_v51 = vpop.xlane.xlu1 %3391 }
0x135c   :  { %v3394_v25 = vmul.f32 0.032258064, %v3392_v51  ;;  %v3389_v45 = vpop.xlane.xlu0 %3388 }
0x135d   :  { %v3393_v26 = vmul.f32 0.032258064, %v3389_v45 }
0x135e   :  { %4560 = vrsqrt.f32 %v3394_v25  ;;  %vm3404_vm1 = vcmp.eq.f32.partialorder %v3394_v25, inf  ;;  %v3407_v18 = vand.u32 2147483648, %v3394_v25  ;;  %vm3406_vm9 = vcmp.eq.f32.partialorder %v3394_v25, 0.0 }
0x135f   :  { %4562 = vrsqrt.f32 %v3393_v26  ;;  %vm3397_vm2 = vcmp.eq.f32.partialorder %v3393_v26, inf  ;;  %v3400_v31 = vand.u32 2147483648, %v3393_v26  ;;  %vm3399_vm10 = vcmp.eq.f32.partialorder %v3393_v26, 0.0 }
0x1368   :  { %v4561_v29 = vpop.eup %4560 }
0x1369   :  { %v4563_v8 = vpop.eup %4562  ;;  %v3403_v1 = vmul.f32 %v4561_v29, %v3394_v25 }
0x136a   :  { %v3396_v3 = vmul.f32 %v4563_v8, %v3393_v26 }
0x136b   :  { %v3405_v33 = vsel %vm3404_vm1, %v3394_v25, %v3403_v1 }
0x136c   :  { %v3408_v34 = vsel %vm3406_vm9, %v3407_v18, %v3405_v33  ;;  %v3398_v36 = vsel %vm3397_vm2, %v3393_v26, %v3396_v3 }
0x136d   :  { %v3410_v37 = vadd.f32 1e-12, %v3408_v34  ;;  %v3401_v28 = vsel %vm3399_vm10, %v3400_v31, %v3398_v36 }
0x136e   :  { %v3409_v40 = vadd.f32 1e-12, %v3401_v28 }
0x136f   :  { %4564 = vrcp.f32 %v3410_v37 }
0x1370   :  { %4566 = vrcp.f32 %v3409_v40 }
0x1379   :  { %v4565_v35 = vpop.eup %4564 }
0x137a   :  { %v4567_v9 = vpop.eup %4566  ;;  %v3414_v44 = vmul.f32 %v4565_v35, %v3384_v21 }
0x137b   :  { %v3413_v46 = vmul.f32 %v4567_v9, %v3383_v22 }
0x137c   :  { %3419 = vrot.lane.b32.xlu1 %v3414_v44, %s4611_s14 }
0x137d   :  { %3417 = vrot.lane.b32.xlu0 %v3413_v46, %s4611_s14 }
0x13ee   :  { %v3420_v16 = vpop.permute.xlu1 %3419 }
0x13ef   :  { %v3424_v55 = vmul.f32 %v3420_v16, %v5000_v38  ;;  %v3418_v56 = vpop.permute.xlu0 %3417 }
0x13f0   :  { %v3423_v59 = vmul.f32 %v3418_v56, %v5000_v38 }
0x13f1   :  { %v3426_v60 = vadd.f32 %v3424_v55, %v5003_v39 }
0x13f2   :  { %v3425_v30 = vadd.f32 %v3423_v59, %v5003_v39 }
0x13f3   :  { %3447 = vrot.lane.b32.xlu0 %v3426_v60, %s4603_s6 }
0x13f4   :  { %3445 = vrot.lane.b32.xlu1 %v3425_v30, %s4603_s6 }
0x13f8   :  { %3531 = vrot.lane.b32.xlu1 %v3442_v2, %s4606_s9 }
0x1465   :  { %v3448_v7 = vpop.permute.xlu0 %3447 }
0x1466   :  { %v3446_v4 = vpop.permute.xlu1 %3445 }
0x1467   :  { %4195 = vmatprep.mubr.msk.f32.mxu1 %vm53_vm0, %v3446_v4 }
0x1468   :  { %4196 = vmatmul.mubr.msk.f32.vlgmr.msra.gmra.mrb[36].mxu1 %vm53_vm0, %v3448_v7 }
0x146a   :  { %v3532_v20 = vpop.permute.xlu1 %3531 }
0x153b   :  { %v4197_v19 = vpop.f32.mrb[36].mxu1 }
0x153c   :  { %v3525_v12 = vadd.f32 %v4197_v19, %v3442_v2  ;;  %v3519_v53 = vpop.f32.mrb[37].mxu1 }
0x153d   :  { %v3520_v17 = vadd.f32 %v3519_v53, %v3442_v2 }
0x153e   :  { %v3529_v15 = vmax.f32 %v3525_v12, 0.0 }
0x153f   :  { %v3528_v32 = vmax.f32 %v3520_v17, 0.0 }
0x1541   :  { %4214 = vmatprep.mubr.msk.f32.mxu0 %vm3534_vm11, %v3528_v32 }
0x1542   :  { %4215 = vmatmul.mubr.msk.f32.vlgmr.msra.gmra.mrb[18].mxu0 %vm3534_vm11, %v3529_v15 }
0x1615   :  { %v4216_v21 = vpop.f32.mrb[18].mxu0 }
0x1616   :  { %v3613_v22 = vadd.f32 %v4216_v21, %v3532_v20  ;;  %v3607_v0 = vpop.f32.mrb[19].mxu0 }
0x1617   :  { %v3608_v23 = vadd.f32 %v3607_v0, %v3532_v20 }
0x1618   :  { %3620 = vrot.lane.b32.xlu1 %v3613_v22, %s4611_s14 }
0x1619   :  { %3618 = vrot.lane.b32.xlu0 %v3608_v23, %s4611_s14 }
0x168a   :  { %v3621_v24 = vpop.permute.xlu1 %3620 }
0x168b   :  { %v3625_v13 = vadd.f32 %v3621_v24, %v3426_v60  ;;  %v3619_v51 = vpop.permute.xlu0 %3618 }
0x168c   :  { %v3624_v25 = vadd.f32 %v3619_v51, %v3425_v30 }
0x168d   :  { %3630 = vrot.lane.b32.xlu1 %v3625_v13, %s4603_s6 }
0x168e   :  { %3628 = vrot.lane.b32.xlu0 %v3624_v25, %s4603_s6 }
0x16ff   :  { %v3631_v45 = vpop.permute.xlu1 %3630 }
0x1700   :  { %v3637_v26 = vsel %vm53_vm0, %v3631_v45, 0.0  ;;  %v3629_v29 = vpop.permute.xlu0 %3628 }
0x1701   :  { %v3634_v8 = vsel %vm53_vm0, %v3629_v29, 0.0  ;;  %3638 = vadd.xlane.f32.xlu1 %v3637_v26 }
0x1702   :  { %3635 = vadd.xlane.f32.xlu0 %v3634_v8 }
0x178e   :  { %v3639_v1 = vpop.xlane.xlu1 %3638 }
0x178f   :  { %v3641_v18 = vmul.f32 0.03125, %v3639_v1  ;;  %v3636_v3 = vpop.xlane.xlu0 %3635 }
0x1790   :  { %v3640_v31 = vmul.f32 0.03125, %v3636_v3 }
0x1791   :  { %v3643_v33 = vsub.f32 %v3625_v13, %v3641_v18 }
0x1792   :  { %v3642_v34 = vsub.f32 %v3624_v25, %v3640_v31 }
0x1793   :  { %v3645_v36 = vmul.f32 %v3643_v33, %v3643_v33 }
0x1794   :  { %v3644_v37 = vmul.f32 %v3642_v34, %v3642_v34 }
0x1795   :  { %3650 = vrot.lane.b32.xlu1 %v3645_v36, %s4603_s6 }
0x1796   :  { %3648 = vrot.lane.b32.xlu0 %v3644_v37, %s4603_s6  ;;  %s4577_s6 = scalar_lea.vmem %s3710_s4, 256 }
0x1797   :  { %p4578_p0 = scmp.ne.s32.totalorder %s3710_s4, %s4577_s6  ;;  %p4583_p2 = scmp.lt.s32.totalorder %s4577_s6, %s4577_s6 }
0x1799   :  { %p4584_p3 = por %p4583_p2, %p4582_p1 }
0x179b   :  { %p4585_p4 = pnand %p4584_p3, %p4578_p0 }
0x1807   :  { %v3651_v28 = vpop.permute.xlu1 %3650 }
0x1808   :  { %v3657_v40 = vsel %vm53_vm0, %v3651_v28, 0.0  ;;  %v3649_v41 = vpop.permute.xlu0 %3648 }
0x1809   :  { %v3654_v42 = vsel %vm53_vm0, %v3649_v41, 0.0  ;;  %3658 = vadd.xlane.f32.xlu1 %v3657_v40 }
0x180a   :  { %3655 = vadd.xlane.f32.xlu0 %v3654_v42 }
0x1896   :  { %v3659_v6 = vpop.xlane.xlu1 %3658 }
0x1897   :  { %v3661_v62 = vmul.f32 0.032258064, %v3659_v6  ;;  %v3656_v43 = vpop.xlane.xlu0 %3655 }
0x1898   :  { %v3660_v58 = vmul.f32 0.032258064, %v3656_v43 }
0x1899   :  { %4568 = vrsqrt.f32 %v3661_v62  ;;  %vm3671_vm12 = vcmp.eq.f32.partialorder %v3661_v62, inf  ;;  %v3674_v46 = vand.u32 2147483648, %v3661_v62  ;;  %vm3673_vm13 = vcmp.eq.f32.partialorder %v3661_v62, 0.0 }
0x189a   :  { %4570 = vrsqrt.f32 %v3660_v58  ;;  %vm3664_vm14 = vcmp.eq.f32.partialorder %v3660_v58, inf  ;;  %v3667_v14 = vand.u32 2147483648, %v3660_v58  ;;  %vm3666_vm15 = vcmp.eq.f32.partialorder %v3660_v58, 0.0 }
0x18a3   :  { %v4569_v35 = vpop.eup %4568 }
0x18a4   :  { %v4571_v9 = vpop.eup %4570  ;;  %v3670_v44 = vmul.f32 %v4569_v35, %v3661_v62 }
0x18a5   :  { %v3663_v52 = vmul.f32 %v4571_v9, %v3660_v58 }
0x18a6   :  { %v3672_v48 = vsel %vm3671_vm12, %v3661_v62, %v3670_v44 }
0x18a7   :  { %v3665_v5 = vsel %vm3664_vm14, %v3660_v58, %v3663_v52  ;;  %v3675_v54 = vsel %vm3673_vm13, %v3674_v46, %v3672_v48 }
0x18a8   :  { %v3677_v57 = vadd.f32 1e-12, %v3675_v54  ;;  %v3668_v61 = vsel %vm3666_vm15, %v3667_v14, %v3665_v5 }
0x18a9   :  { %v3676_v27 = vadd.f32 1e-12, %v3668_v61 }
0x18aa   :  { %4572 = vrcp.f32 %v3677_v57 }
0x18ab   :  { %4574 = vrcp.f32 %v3676_v27 }
0x18b4   :  { %v4573_v50 = vpop.eup %4572 }
0x18b5   :  { %v4575_v16 = vpop.eup %4574  ;;  %v3681_v55 = vmul.f32 %v4573_v50, %v3643_v33 }
0x18b6   :  { %v3680_v56 = vmul.f32 %v4575_v16, %v3642_v34 }
0x18b7   :  { %3686 = vrot.lane.b32.xlu1 %v3681_v55, %s4611_s14 }
0x18b8   :  { %3684 = vrot.lane.b32.xlu0 %v3680_v56, %s4611_s14 }
0x1929   :  { %v3687_v59 = vpop.permute.xlu1 %3686 }
0x192a   :  { %v3691_v60 = vmul.f32 %v3687_v59, %v5000_v38  ;;  %v3685_v30 = vpop.permute.xlu0 %3684 }
0x192b   :  { %v3690_v47 = vmul.f32 %v3685_v30, %v5000_v38 }
0x192c   :  { %v3693_v63 = vadd.f32 %v3691_v60, %v5003_v39 }
0x192d   :  { %v3692_v2 = vadd.f32 %v3690_v47, %v5003_v39 }
0x192e   :  { %3698 = vrot.lane.b32.xlu1 %v3693_v63, %s4606_s9 }
0x192f   :  { %3696 = vrot.lane.b32.xlu0 %v3692_v2, %s4606_s9 }
0x19a0   :  { %v3699_v4 = vpop.permute.xlu1 %3698 }
0x19a1   :  { %3703 = vst.msk [vmem:[#allocation2 + $0x8] sm:$0xff] %vm53_vm0, %v3699_v4  ;;  %v3697_v7 = vpop.permute.xlu0 %3696 }
0x19a2   :  { %3702 = vst.msk [vmem:[#allocation2] sm:$0xff] %vm53_vm0, %v3697_v7 }
0x19a3   :  { %4588 = shalt.err (!%p4585_p4)
}
0x19a4   :  { %s4589_s9 = scalar_lea.hbm %s5309_s5, 256 }
0x19a5   :  { %p4590_p5 = scmp.ne.s32.totalorder %s5309_s5, %s4589_s9  ;;  %p4593_p6 = scmp.lt.u32.totalorder %s4589_s9, %s5309_s5 }
0x19a7   :  { %p4595_p7 = pnand %p4593_p6, %p4590_p5 }
0x19a9   :  { %4598 = shalt.err (!%p4595_p7)
}
0x19aa   :  { %s4615_s8 = smov 128   ;;  %s4616_s10 = smov 8  }
0x19ab   :  { %3715 = dma.vmem_to_hbm [thread:$0]  %s3710_s4, 256, %s5309_s5, [#allocation3], %s4615_s8, %s4615_s8, %s4616_s10  }
0x19ac   :  { %4599 = dma.done.wait [#allocation3], 256  }
0x19ad   :  { %4600 = vsyncadd [#allocation3], 4294967040 }
0x19ae   :  { %3719 = vsyncpa [#allocation3], 1 }

</bundles_post_ra>
